<compile_context>
chip_gen: v7x
topology: tpu7x:2x2x1
jax: 0.10.0
libtpu: 0.0.40
codegen_flags: <defaults>
</compile_context>

<pallas_src>
import functools

import jax
import jax.numpy as jnp
from jax.experimental import pallas as pl
from jax.experimental.pallas import tpu as pltpu

PROJ = 256


# ----------------------------- Pallas kernel --------------------------------
def head_kernel(ph_ref, gh_ref,
                wp_ref, bp_ref, wg_ref, bg_ref,
                w1p_ref, w1g_ref, w1d_ref, b1_ref,
                w2_ref, b2_ref,
                out_ref,
                psum_ref, gsum_ref,
                *, inv_lp, inv_lg):
    l = pl.program_id(1)

    @pl.when(l == 0)
    def _():
        psum_ref[...] = jnp.zeros_like(psum_ref)
        gsum_ref[...] = jnp.zeros_like(gsum_ref)

    # Streamed sequence pooling: bf16 blocks from HBM, fp32 accumulation.
    # (Matches torch .mean(dim=1); the attention mask is NOT used by the
    #  pooling in the reference forward.)  Padded rows are zeros, so they do
    #  not perturb the sum; inv_l* divides by the true sequence length.
    psum_ref[...] += jnp.sum(ph_ref[...].astype(jnp.float32), axis=1)
    gsum_ref[...] += jnp.sum(gh_ref[...].astype(jnp.float32), axis=1)

    @pl.when(l == pl.num_programs(1) - 1)
    def _():
        # bf16 operands into the MXU, fp32 accumulation.
        p_emb = (psum_ref[...] * inv_lp).astype(jnp.bfloat16)   # [Bb, Hp]
        g_emb = (gsum_ref[...] * inv_lg).astype(jnp.bfloat16)   # [Bb, Hg]

        # protein_reshape / go_reshape: Linear + tanh
        p = jnp.tanh(jnp.dot(p_emb, wp_ref[...],
                             preferred_element_type=jnp.float32) + bp_ref[...])
        g = jnp.tanh(jnp.dot(g_emb, wg_ref[...],
                             preferred_element_type=jnp.float32) + bg_ref[...])
        d = jnp.abs(p - g)

        # MLP layer 1 on concat([p, g, |p-g|]) via decomposed K=256 matmuls
        h = (jnp.dot(p.astype(jnp.bfloat16), w1p_ref[...],
                     preferred_element_type=jnp.float32)
             + jnp.dot(g.astype(jnp.bfloat16), w1g_ref[...],
                       preferred_element_type=jnp.float32)
             + jnp.dot(d.astype(jnp.bfloat16), w1d_ref[...],
                       preferred_element_type=jnp.float32)
             + b1_ref[...])
        h = jnp.maximum(h, 0.0)                                  # ReLU
        # TODO(synk): nn.Dropout(0.1) is identity in eval mode; a training-mode
        # kernel needs a pltpu.prng_random_bits keep-mask here.

        # MLP layer 2 (256 -> 1) as VPU multiply + lane reduction (avoids an
        # N=1 MXU matmul and its masked-store output).
        out_ref[...] = (jnp.sum(h * w2_ref[...], axis=-1, keepdims=True)
                        + b2_ref[...]).astype(out_ref.dtype)


# ------------------------- block / VMEM planning ------------------------------
def _round_up(x, m):
    return -(-x // m) * m


def _vmem_capacity_bytes():
    cap = None
    try:
        cap = getattr(pltpu.get_tpu_info(), "vmem_capacity_bytes", None)
    except Exception:
        cap = None
    if not cap:
        cap = 64 << 20          # conservative fallback = v7x per-TC VMEM
    return int(cap)


def _pick_batch_block(B, cap=128):
    """Largest multiple-of-8 divisor of B that still leaves >= 2 batch blocks,
    so the "parallel" grid axis can shard across v7x's two TensorCores."""
    if B >= 16:
        hi = min(cap, (B // 2) // 8 * 8)
        for cand in range(hi, 7, -8):
            if B % cand == 0:
                return cand
    return B


def _plan_seq_blocks(Lp, Hp, Lg, Hg, b_blk, itemsize, stream_budget):
    """Common seq-block count for both streams (balanced per-step DMA).

    Each stream's block is sized so one (b_blk, l_blk, H) bf16 block stays
    under `stream_budget`; sequences get zero-padded up to nblk * l_blk."""
    def n_blocks(L, H):
        rows = stream_budget // max(1, b_blk * H * itemsize)
        rows = max(8, rows // 8 * 8)
        return max(1, -(-L // rows))

    nblk = max(n_blocks(Lp, Hp), n_blocks(Lg, Hg))
    lp_blk = _round_up(-(-Lp // nblk), 8)
    lg_blk = _round_up(-(-Lg // nblk), 8)
    return nblk, lp_blk, lg_blk


# ------------------------------ wrapper --------------------------------------
def predictor_head(protein_hidden, go_hidden, params,
                   *, b_blk=None, stream_budget_bytes=None):
    B, Lp, Hp = protein_hidden.shape
    _, Lg, Hg = go_hidden.shape

    weights = (params["wp"], params["bp"], params["wg"], params["bg"],
               params["w1p"], params["w1g"], params["w1d"], params["b1"],
               params["w2"], params["b2"])
    w_bytes = sum(int(w.size) * w.dtype.itemsize for w in weights)

    b_blk = b_blk or _pick_batch_block(B)
    assert B % b_blk == 0

    itemsize = protein_hidden.dtype.itemsize
    vmem_cap = _vmem_capacity_bytes()
    usable = vmem_cap - (16 << 20)             # headroom for Mosaic internals
    scratch_bytes = 4 * b_blk * (Hp + Hg)
    if stream_budget_bytes is None:
        # 2 streams x 2 pipeline buffers + double-buffered resident weights.
        stream_budget_bytes = (usable - 2 * w_bytes - scratch_bytes
                               - (4 << 20)) // 4
        stream_budget_bytes = max(1 << 20, min(stream_budget_bytes, 16 << 20))

    nblk, lp_blk, lg_blk = _plan_seq_blocks(
        Lp, Hp, Lg, Hg, b_blk, itemsize, stream_budget_bytes)

    # Zero-pad sequences so every grid step moves a full block (no partial
    # tails, no per-step guards, no full-sequence fallback that can blow VMEM).
    def pad_seq(x, L, blk):
        tgt = nblk * blk
        return x if tgt == L else jnp.pad(x, ((0, 0), (0, tgt - L), (0, 0)))

    protein_hidden = pad_seq(protein_hidden, Lp, lp_blk)
    go_hidden = pad_seq(go_hidden, Lg, lg_blk)

    grid = (B // b_blk, nblk)

    kernel = functools.partial(head_kernel,
                               inv_lp=float(1.0 / Lp), inv_lg=float(1.0 / Lg))

    # Hidden-state blocks stream through VMEM (double-buffered by the pipeline),
    # both streams advance one block per grid step (balanced DMA).
    ph_spec = pl.BlockSpec((b_blk, lp_blk, Hp), lambda b, l: (b, l, 0))
    gh_spec = pl.BlockSpec((b_blk, lg_blk, Hg), lambda b, l: (b, l, 0))

    def resident(arr):
        # Constant index_map: DMA'd once, stays VMEM-resident for all steps.
        # (Single-buffering via pipeline_mode=pl.Buffered(1) would trim their
        #  footprint further; kept default for portability — weights are bf16.)
        return pl.BlockSpec(arr.shape, lambda b, l: (0, 0))

    in_specs = [ph_spec, gh_spec] + [resident(w) for w in weights]
    out_spec = pl.BlockSpec((b_blk, 1), lambda b, l: (b, 0))

    hid_bytes = (int(protein_hidden.size) * itemsize
                 + int(go_hidden.size) * go_hidden.dtype.itemsize)
    cost = pl.CostEstimate(
        flops=int(2 * B * (Hp * PROJ + Hg * PROJ + 3 * PROJ * PROJ + PROJ)
                  + B * (Lp * Hp + Lg * Hg)),
        transcendentals=int(2 * B * PROJ),
        bytes_accessed=int(hid_bytes + w_bytes + B * 4),
    )

    blk_bytes = (b_blk * lp_blk * Hp + b_blk * lg_blk * Hg) * itemsize
    vmem_limit = 2 * blk_bytes + 2 * w_bytes + scratch_bytes + (8 << 20)
    vmem_limit = int(min(max(vmem_limit, 16 << 20), vmem_cap - (8 << 20)))

    return pl.pallas_call(
        kernel,
        out_shape=jax.ShapeDtypeStruct((B, 1), jnp.float32),
        grid=grid,
        in_specs=in_specs,
        out_specs=out_spec,
        scratch_shapes=[pltpu.VMEM((b_blk, Hp), jnp.float32),
                        pltpu.VMEM((b_blk, Hg), jnp.float32)],
        compiler_params=pltpu.CompilerParams(
            dimension_semantics=("parallel", "arbitrary"),
            vmem_limit_bytes=vmem_limit),
        cost_estimate=cost,
    )(protein_hidden, go_hidden, *weights)


# ------------------------------ full forward ---------------------------------
def protein_predictor_forward(params,
                              protein_input_ids, protein_attention_mask,
                              go_input_ids, go_attention_mask,
                              **head_kwargs):
    # TODO(synk): the two pretrained HF transformer backbones have no clean
    # Pallas equivalent here; replaced by deterministic bf16 embedding lookups
    # producing last_hidden_state of shape [B, L, H].
    # TODO(synk): fusing this gather into the kernel (scalar-prefetched ids +
    # per-row DMA from the HBM table) would remove the extra HBM round trip of
    # the synthetic [B, L, H] tensor; skipped since the tensor only exists
    # because the backbone is a stand-in.
    protein_hidden = params["protein_embed"][protein_input_ids]   # bf16 [B,Lp,Hp]
    go_hidden = params["go_embed"][go_input_ids]                  # bf16 [B,Lg,Hg]
    return predictor_head(protein_hidden, go_hidden, params, **head_kwargs)


# ---------------------------- deterministic init ------------------------------
def init_params(key, protein_hidden_dim, go_hidden_dim, vocab=64, proj=PROJ):
    ks = jax.random.split(key, 10)

    def lin_w(k, fan_in, fan_out, dtype=jnp.bfloat16):
        bound = 1.0 / jnp.sqrt(fan_in)
        return jax.random.uniform(k, (fan_in, fan_out), jnp.float32,
                                  -bound, bound).astype(dtype)

    def lin_b(k, fan_in, fan_out):
        bound = 1.0 / jnp.sqrt(fan_in)
        return jax.random.uniform(k, (1, fan_out), jnp.float32, -bound, bound)

    # mlp[0]: Linear(3*256 -> 256) built once with the correct fan-in, then
    # split into the three K=256 slices used by the concat decomposition.
    w1 = lin_w(ks[6], 3 * proj, proj)                               # (768, 256) bf16

    return {
        # synthetic backbone embedding tables, stored bf16 so the streamed
        # [B, L, H] hidden states cost half the HBM bytes (fp32 accum in-kernel)
        "protein_embed": (0.02 * jax.random.normal(
            ks[0], (vocab, protein_hidden_dim), jnp.float32)).astype(jnp.bfloat16),
        "go_embed": (0.02 * jax.random.normal(
            ks[1], (vocab, go_hidden_dim), jnp.float32)).astype(jnp.bfloat16),
        # protein_reshape / go_reshape (bf16 weights, fp32 biases)
        "wp": lin_w(ks[2], protein_hidden_dim, proj),
        "bp": lin_b(ks[3], protein_hidden_dim, proj),
        "wg": lin_w(ks[4], go_hidden_dim, proj),
        "bg": lin_b(ks[5], go_hidden_dim, proj),
        # mlp[0] slices (each (256, 256) bf16) + fp32 bias
        "w1p": w1[:proj], "w1g": w1[proj:2 * proj], "w1d": w1[2 * proj:],
        "b1": lin_b(ks[7], 3 * proj, proj),
        # mlp[3]: Linear(256 -> 1); fp32 [1, 256] row for the VPU reduce
        "w2": lin_w(ks[8], proj, 1, dtype=jnp.float32).reshape(1, proj),
        "b2": lin_b(ks[9], proj, 1).reshape(1, 1),
    }


if __name__ == "__main__":
    key = jax.random.PRNGKey(0)
    k_params, k_pid, k_gid = jax.random.split(key, 3)

    # small stand-in shapes (real: Hp=1024, Hg=768, seq up to 512)
    B, Lp, Lg = 16, 48, 44
    Hp, Hg = 256, 128
    VOCAB = 64

    params = init_params(k_params, Hp, Hg, vocab=VOCAB)

    protein_input_ids = jax.random.randint(k_pid, (B, Lp), 0, VOCAB, dtype=jnp.int32)
    go_input_ids = jax.random.randint(k_gid, (B, Lg), 0, VOCAB, dtype=jnp.int32)
    protein_attention_mask = jnp.ones((B, Lp), jnp.int32)
    go_attention_mask = jnp.ones((B, Lg), jnp.int32)

    # Tiny per-block budget so the test exercises: >=2 batch blocks (b_blk=8,
    # parallel axis splits across cores), a multi-step seq reduction
    # (nblk=6, lp_blk=8, lg_blk=8), and zero-padding of the go stream (44->48).
    out = protein_predictor_forward(params,
                                    protein_input_ids, protein_attention_mask,
                                    go_input_ids, go_attention_mask,
                                    stream_budget_bytes=32 << 10)
    out = jax.block_until_ready(out)
    assert out.shape == (B, 1) and out.dtype == jnp.float32

    # pure-JAX reference of the fused head (same bf16 hidden/weights, fp32 math)
    ph = params["protein_embed"][protein_input_ids].astype(jnp.float32)
    gh = params["go_embed"][go_input_ids].astype(jnp.float32)
    p_emb = ph.mean(1).astype(jnp.bfloat16)
    g_emb = gh.mean(1).astype(jnp.bfloat16)
    p = jnp.tanh(jnp.dot(p_emb, params["wp"],
                         preferred_element_type=jnp.float32) + params["bp"])
    g = jnp.tanh(jnp.dot(g_emb, params["wg"],
                         preferred_element_type=jnp.float32) + params["bg"])
    d = jnp.abs(p - g)
    h = jnp.maximum(
        jnp.dot(p.astype(jnp.bfloat16), params["w1p"],
                preferred_element_type=jnp.float32)
        + jnp.dot(g.astype(jnp.bfloat16), params["w1g"],
                  preferred_element_type=jnp.float32)
        + jnp.dot(d.astype(jnp.bfloat16), params["w1d"],
                  preferred_element_type=jnp.float32)
        + params["b1"], 0.0)
    ref = jnp.sum(h * params["w2"], axis=-1, keepdims=True) + params["b2"]
    assert jnp.allclose(out, ref, atol=1e-3, rtol=1e-3), \
        float(jnp.max(jnp.abs(out - ref)))

    print("KERNEL_OK")
</pallas_src>

<mosaic_0001>
module attributes {stable_mosaic.version = 11 : i64} {
  func.func @head_kernel(%arg0: i32, %arg1: i32, %arg2: memref<8x8x256xbf16, #tpu.memory_space<vmem>>, %arg3: memref<8x8x128xbf16, #tpu.memory_space<vmem>>, %arg4: memref<256x256xbf16, #tpu.memory_space<vmem>>, %arg5: memref<1x256xf32, #tpu.memory_space<vmem>>, %arg6: memref<128x256xbf16, #tpu.memory_space<vmem>>, %arg7: memref<1x256xf32, #tpu.memory_space<vmem>>, %arg8: memref<256x256xbf16, #tpu.memory_space<vmem>>, %arg9: memref<256x256xbf16, #tpu.memory_space<vmem>>, %arg10: memref<256x256xbf16, #tpu.memory_space<vmem>>, %arg11: memref<1x256xf32, #tpu.memory_space<vmem>>, %arg12: memref<1x256xf32, #tpu.memory_space<vmem>>, %arg13: memref<1x1xf32, #tpu.memory_space<vmem>>, %arg14: memref<8x1xf32, #tpu.memory_space<vmem>>, %arg15: memref<8x256xf32, #tpu.memory_space<vmem>>, %arg16: memref<8x128xf32, #tpu.memory_space<vmem>>) attributes {dimension_semantics = [#tpu.dimension_semantics<parallel>, #tpu.dimension_semantics<arbitrary>], iteration_bounds = array<i64: 2, 6>, scalar_prefetch = 0 : i64, scratch_operands = 2 : i64, tpu.core_type = #tpu.core_type<tc>, window_params = [{transform_indices = @transform_0, window_bounds = array<i64: 8, 8, 256>}, {transform_indices = @transform_1, window_bounds = array<i64: 8, 8, 128>}, {pipeline_mode = #tpu.pipeline_mode<synchronous>, transform_indices = @transform_2, window_bounds = array<i64: 256, 256>}, {pipeline_mode = #tpu.pipeline_mode<synchronous>, transform_indices = @transform_3, window_bounds = array<i64: 1, 256>}, {pipeline_mode = #tpu.pipeline_mode<synchronous>, transform_indices = @transform_4, window_bounds = array<i64: 128, 256>}, {pipeline_mode = #tpu.pipeline_mode<synchronous>, transform_indices = @transform_5, window_bounds = array<i64: 1, 256>}, {pipeline_mode = #tpu.pipeline_mode<synchronous>, transform_indices = @transform_6, window_bounds = array<i64: 256, 256>}, {pipeline_mode = #tpu.pipeline_mode<synchronous>, transform_indices = @transform_7, window_bounds = array<i64: 256, 256>}, {pipeline_mode = #tpu.pipeline_mode<synchronous>, transform_indices = @transform_8, window_bounds = array<i64: 256, 256>}, {pipeline_mode = #tpu.pipeline_mode<synchronous>, transform_indices = @transform_9, window_bounds = array<i64: 1, 256>}, {pipeline_mode = #tpu.pipeline_mode<synchronous>, transform_indices = @transform_10, window_bounds = array<i64: 1, 256>}, {pipeline_mode = #tpu.pipeline_mode<synchronous>, transform_indices = @transform_11, window_bounds = array<i64: 1, 1>}, {transform_indices = @transform_12, window_bounds = array<i64: 8, 1>}]} {
    %c0_i32 = arith.constant 0 : i32
    %0 = arith.cmpi eq, %arg1, %c0_i32 : i32
    %1 = arith.extui %0 : i1 to i32
    %c0_i32_0 = arith.constant 0 : i32
    %2 = arith.cmpi ne, %1, %c0_i32_0 : i32
    scf.if %2 {
      %cst_16 = arith.constant 0.000000e+00 : f32
      %18 = vector.broadcast %cst_16 : f32 to vector<8x256xf32>
      %c0_17 = arith.constant 0 : index
      %c0_18 = arith.constant 0 : index
      %19 = vector.load %arg15[%c0_17, %c0_18] : memref<8x256xf32, #tpu.memory_space<vmem>>, vector<8x256xf32>
      tpu.vector_store %arg15[%c0_17, %c0_18], %18 {strides = array<i32>} : memref<8x256xf32, #tpu.memory_space<vmem>>, vector<8x256xf32>,
      %cst_19 = arith.constant 0.000000e+00 : f32
      %20 = vector.broadcast %cst_19 : f32 to vector<8x128xf32>
      %c0_20 = arith.constant 0 : index
      %c0_21 = arith.constant 0 : index
      %21 = vector.load %arg16[%c0_20, %c0_21] : memref<8x128xf32, #tpu.memory_space<vmem>>, vector<8x128xf32>
      tpu.vector_store %arg16[%c0_20, %c0_21], %20 {strides = array<i32>} : memref<8x128xf32, #tpu.memory_space<vmem>>, vector<8x128xf32>,
    } else {
    }
    %c0 = arith.constant 0 : index
    %c0_1 = arith.constant 0 : index
    %3 = vector.load %arg15[%c0, %c0_1] : memref<8x256xf32, #tpu.memory_space<vmem>>, vector<8x256xf32>
    %c0_2 = arith.constant 0 : index
    %c0_3 = arith.constant 0 : index
    %c0_4 = arith.constant 0 : index
    %4 = vector.load %arg2[%c0_2, %c0_3, %c0_4] : memref<8x8x256xbf16, #tpu.memory_space<vmem>>, vector<8x8x256xbf16>
    %5 = arith.extf %4 : vector<8x8x256xbf16> to vector<8x8x256xf32>
    %cst = arith.constant dense<0.000000e+00> : vector<8x256xf32>
    %6 = vector.multi_reduction <add>, %5, %cst [1] : vector<8x8x256xf32> to vector<8x256xf32>
    %7 = arith.addf %3, %6 : vector<8x256xf32>
    %c0_5 = arith.constant 0 : index
    %c0_6 = arith.constant 0 : index
    %8 = vector.load %arg15[%c0_5, %c0_6] : memref<8x256xf32, #tpu.memory_space<vmem>>, vector<8x256xf32>
    tpu.vector_store %arg15[%c0_5, %c0_6], %7 {strides = array<i32>} : memref<8x256xf32, #tpu.memory_space<vmem>>, vector<8x256xf32>,
    %c0_7 = arith.constant 0 : index
    %c0_8 = arith.constant 0 : index
    %9 = vector.load %arg16[%c0_7, %c0_8] : memref<8x128xf32, #tpu.memory_space<vmem>>, vector<8x128xf32>
    %c0_9 = arith.constant 0 : index
    %c0_10 = arith.constant 0 : index
    %c0_11 = arith.constant 0 : index
    %10 = vector.load %arg3[%c0_9, %c0_10, %c0_11] : memref<8x8x128xbf16, #tpu.memory_space<vmem>>, vector<8x8x128xbf16>
    %11 = arith.extf %10 : vector<8x8x128xbf16> to vector<8x8x128xf32>
    %cst_12 = arith.constant dense<0.000000e+00> : vector<8x128xf32>
    %12 = vector.multi_reduction <add>, %11, %cst_12 [1] : vector<8x8x128xf32> to vector<8x128xf32>
    %13 = arith.addf %9, %12 : vector<8x128xf32>
    %c0_13 = arith.constant 0 : index
    %c0_14 = arith.constant 0 : index
    %14 = vector.load %arg16[%c0_13, %c0_14] : memref<8x128xf32, #tpu.memory_space<vmem>>, vector<8x128xf32>
    tpu.vector_store %arg16[%c0_13, %c0_14], %13 {strides = array<i32>} : memref<8x128xf32, #tpu.memory_space<vmem>>, vector<8x128xf32>,
    %c5_i32 = arith.constant 5 : i32
    %15 = arith.cmpi eq, %arg1, %c5_i32 : i32
    %16 = arith.extui %15 : i1 to i32
    %c0_i32_15 = arith.constant 0 : i32
    %17 = arith.cmpi ne, %16, %c0_i32_15 : i32
    scf.if %17 {
      %c0_16 = arith.constant 0 : index
      %c0_17 = arith.constant 0 : index
      %18 = vector.load %arg15[%c0_16, %c0_17] : memref<8x256xf32, #tpu.memory_space<vmem>>, vector<8x256xf32>
      %cst_18 = arith.constant 0.020833334 : f32
      %19 = vector.broadcast %cst_18 : f32 to vector<8x256xf32>
      %20 = arith.mulf %18, %19 : vector<8x256xf32>
      %21 = arith.truncf %20 : vector<8x256xf32> to vector<8x256xbf16>
      %c0_19 = arith.constant 0 : index
      %c0_20 = arith.constant 0 : index
      %22 = vector.load %arg16[%c0_19, %c0_20] : memref<8x128xf32, #tpu.memory_space<vmem>>, vector<8x128xf32>
      %cst_21 = arith.constant 0.0227272734 : f32
      %23 = vector.broadcast %cst_21 : f32 to vector<8x128xf32>
      %24 = arith.mulf %22, %23 : vector<8x128xf32>
      %25 = arith.truncf %24 : vector<8x128xf32> to vector<8x128xbf16>
      %c0_22 = arith.constant 0 : index
      %c0_23 = arith.constant 0 : index
      %26 = vector.load %arg4[%c0_22, %c0_23] : memref<256x256xbf16, #tpu.memory_space<vmem>>, vector<256x256xbf16>
      %cst_24 = arith.constant dense<0.000000e+00> : vector<8x256xf32>
      %27 = tpu.matmul %21, %26, %cst_24 {dimension_numbers = #tpu.dot_dimension_numbers<[1], [0], [0], [1], [0, 0, 1, 1], [], []>} : vector<8x256xbf16>, vector<256x256xbf16>, vector<8x256xf32> -> vector<8x256xf32>
      %c0_25 = arith.constant 0 : index
      %c0_26 = arith.constant 0 : index
      %28 = vector.load %arg5[%c0_25, %c0_26] : memref<1x256xf32, #tpu.memory_space<vmem>>, vector<1x256xf32>
      %29 = vector.broadcast %28 : vector<1x256xf32> to vector<8x256xf32>
      %30 = arith.addf %27, %29 : vector<8x256xf32>
      %31 = math.tanh %30 : vector<8x256xf32>
      %c0_27 = arith.constant 0 : index
      %c0_28 = arith.constant 0 : index
      %32 = vector.load %arg6[%c0_27, %c0_28] : memref<128x256xbf16, #tpu.memory_space<vmem>>, vector<128x256xbf16>
      %cst_29 = arith.constant dense<0.000000e+00> : vector<8x256xf32>
      %33 = tpu.matmul %25, %32, %cst_29 {dimension_numbers = #tpu.dot_dimension_numbers<[1], [0], [0], [1], [0, 0, 1, 1], [], []>} : vector<8x128xbf16>, vector<128x256xbf16>, vector<8x256xf32> -> vector<8x256xf32>
      %c0_30 = arith.constant 0 : index
      %c0_31 = arith.constant 0 : index
      %34 = vector.load %arg7[%c0_30, %c0_31] : memref<1x256xf32, #tpu.memory_space<vmem>>, vector<1x256xf32>
      %35 = vector.broadcast %34 : vector<1x256xf32> to vector<8x256xf32>
      %36 = arith.addf %33, %35 : vector<8x256xf32>
      %37 = math.tanh %36 : vector<8x256xf32>
      %38 = arith.subf %31, %37 : vector<8x256xf32>
      %39 = math.absf %38 : vector<8x256xf32>
      %40 = arith.truncf %31 : vector<8x256xf32> to vector<8x256xbf16>
      %c0_32 = arith.constant 0 : index
      %c0_33 = arith.constant 0 : index
      %41 = vector.load %arg8[%c0_32, %c0_33] : memref<256x256xbf16, #tpu.memory_space<vmem>>, vector<256x256xbf16>
      %cst_34 = arith.constant dense<0.000000e+00> : vector<8x256xf32>
      %42 = tpu.matmul %40, %41, %cst_34 {dimension_numbers = #tpu.dot_dimension_numbers<[1], [0], [0], [1], [0, 0, 1, 1], [], []>} : vector<8x256xbf16>, vector<256x256xbf16>, vector<8x256xf32> -> vector<8x256xf32>
      %43 = arith.truncf %37 : vector<8x256xf32> to vector<8x256xbf16>
      %c0_35 = arith.constant 0 : index
      %c0_36 = arith.constant 0 : index
      %44 = vector.load %arg9[%c0_35, %c0_36] : memref<256x256xbf16, #tpu.memory_space<vmem>>, vector<256x256xbf16>
      %cst_37 = arith.constant dense<0.000000e+00> : vector<8x256xf32>
      %45 = tpu.matmul %43, %44, %cst_37 {dimension_numbers = #tpu.dot_dimension_numbers<[1], [0], [0], [1], [0, 0, 1, 1], [], []>} : vector<8x256xbf16>, vector<256x256xbf16>, vector<8x256xf32> -> vector<8x256xf32>
      %46 = arith.addf %42, %45 : vector<8x256xf32>
      %47 = arith.truncf %39 : vector<8x256xf32> to vector<8x256xbf16>
      %c0_38 = arith.constant 0 : index
      %c0_39 = arith.constant 0 : index
      %48 = vector.load %arg10[%c0_38, %c0_39] : memref<256x256xbf16, #tpu.memory_space<vmem>>, vector<256x256xbf16>
      %cst_40 = arith.constant dense<0.000000e+00> : vector<8x256xf32>
      %49 = tpu.matmul %47, %48, %cst_40 {dimension_numbers = #tpu.dot_dimension_numbers<[1], [0], [0], [1], [0, 0, 1, 1], [], []>} : vector<8x256xbf16>, vector<256x256xbf16>, vector<8x256xf32> -> vector<8x256xf32>
      %50 = arith.addf %46, %49 : vector<8x256xf32>
      %c0_41 = arith.constant 0 : index
      %c0_42 = arith.constant 0 : index
      %51 = vector.load %arg11[%c0_41, %c0_42] : memref<1x256xf32, #tpu.memory_space<vmem>>, vector<1x256xf32>
      %52 = vector.broadcast %51 : vector<1x256xf32> to vector<8x256xf32>
      %53 = arith.addf %50, %52 : vector<8x256xf32>
      %cst_43 = arith.constant 0.000000e+00 : f32
      %54 = vector.broadcast %cst_43 : f32 to vector<8x256xf32>
      %55 = arith.maximumf %53, %54 : vector<8x256xf32>
      %c0_44 = arith.constant 0 : index
      %c0_45 = arith.constant 0 : index
      %56 = vector.load %arg12[%c0_44, %c0_45] : memref<1x256xf32, #tpu.memory_space<vmem>>, vector<1x256xf32>
      %57 = vector.broadcast %56 : vector<1x256xf32> to vector<8x256xf32>
      %58 = arith.mulf %55, %57 : vector<8x256xf32>
      %cst_46 = arith.constant dense<0.000000e+00> : vector<8xf32>
      %59 = vector.multi_reduction <add>, %58, %cst_46 [1] : vector<8x256xf32> to vector<8xf32>
      %60 = vector.shape_cast %59 : vector<8xf32> to vector<8x1xf32>
      %c0_47 = arith.constant 0 : index
      %c0_48 = arith.constant 0 : index
      %61 = vector.load %arg13[%c0_47, %c0_48] : memref<1x1xf32, #tpu.memory_space<vmem>>, vector<1x1xf32>
      %62 = vector.broadcast %61 : vector<1x1xf32> to vector<8x1xf32>
      %63 = arith.addf %60, %62 : vector<8x1xf32>
      %c0_49 = arith.constant 0 : index
      %c0_50 = arith.constant 0 : index
      %64 = vector.load %arg14[%c0_49, %c0_50] : memref<8x1xf32, #tpu.memory_space<vmem>>, vector<8x1xf32>
      tpu.vector_store %arg14[%c0_49, %c0_50], %63 {strides = array<i32>} : memref<8x1xf32, #tpu.memory_space<vmem>>, vector<8x1xf32>,
    } else {
    }
    return
  }
  func.func @transform_0(%arg0: i32, %arg1: i32) -> (i32, i32, i32) {
    %c0_i32 = arith.constant 0 : i32
    %c0_i32_0 = arith.constant 0 : i32
    return %arg0, %arg1, %c0_i32 : i32, i32, i32
  }
  func.func @transform_1(%arg0: i32, %arg1: i32) -> (i32, i32, i32) {
    %c0_i32 = arith.constant 0 : i32
    %c0_i32_0 = arith.constant 0 : i32
    return %arg0, %arg1, %c0_i32 : i32, i32, i32
  }
  func.func @transform_2(%arg0: i32, %arg1: i32) -> (i32, i32) {
    %c0_i32 = arith.constant 0 : i32
    %c0_i32_0 = arith.constant 0 : i32
    %c0_i32_1 = arith.constant 0 : i32
    return %c0_i32, %c0_i32_0 : i32, i32
  }
  func.func @transform_3(%arg0: i32, %arg1: i32) -> (i32, i32) {
    %c0_i32 = arith.constant 0 : i32
    %c0_i32_0 = arith.constant 0 : i32
    %c0_i32_1 = arith.constant 0 : i32
    return %c0_i32, %c0_i32_0 : i32, i32
  }
  func.func @transform_4(%arg0: i32, %arg1: i32) -> (i32, i32) {
    %c0_i32 = arith.constant 0 : i32
    %c0_i32_0 = arith.constant 0 : i32
    %c0_i32_1 = arith.constant 0 : i32
    return %c0_i32, %c0_i32_0 : i32, i32
  }
  func.func @transform_5(%arg0: i32, %arg1: i32) -> (i32, i32) {
    %c0_i32 = arith.constant 0 : i32
    %c0_i32_0 = arith.constant 0 : i32
    %c0_i32_1 = arith.constant 0 : i32
    return %c0_i32, %c0_i32_0 : i32, i32
  }
  func.func @transform_6(%arg0: i32, %arg1: i32) -> (i32, i32) {
    %c0_i32 = arith.constant 0 : i32
    %c0_i32_0 = arith.constant 0 : i32
    %c0_i32_1 = arith.constant 0 : i32
    return %c0_i32, %c0_i32_0 : i32, i32
  }
  func.func @transform_7(%arg0: i32, %arg1: i32) -> (i32, i32) {
    %c0_i32 = arith.constant 0 : i32
    %c0_i32_0 = arith.constant 0 : i32
    %c0_i32_1 = arith.constant 0 : i32
    return %c0_i32, %c0_i32_0 : i32, i32
  }
  func.func @transform_8(%arg0: i32, %arg1: i32) -> (i32, i32) {
    %c0_i32 = arith.constant 0 : i32
    %c0_i32_0 = arith.constant 0 : i32
    %c0_i32_1 = arith.constant 0 : i32
    return %c0_i32, %c0_i32_0 : i32, i32
  }
  func.func @transform_9(%arg0: i32, %arg1: i32) -> (i32, i32) {
    %c0_i32 = arith.constant 0 : i32
    %c0_i32_0 = arith.constant 0 : i32
    %c0_i32_1 = arith.constant 0 : i32
    return %c0_i32, %c0_i32_0 : i32, i32
  }
  func.func @transform_10(%arg0: i32, %arg1: i32) -> (i32, i32) {
    %c0_i32 = arith.constant 0 : i32
    %c0_i32_0 = arith.constant 0 : i32
    %c0_i32_1 = arith.constant 0 : i32
    return %c0_i32, %c0_i32_0 : i32, i32
  }
  func.func @transform_11(%arg0: i32, %arg1: i32) -> (i32, i32) {
    %c0_i32 = arith.constant 0 : i32
    %c0_i32_0 = arith.constant 0 : i32
    %c0_i32_1 = arith.constant 0 : i32
    return %c0_i32, %c0_i32_0 : i32, i32
  }
  func.func @transform_12(%arg0: i32, %arg1: i32) -> (i32, i32) {
    %c0_i32 = arith.constant 0 : i32
    %c0_i32_0 = arith.constant 0 : i32
    return %arg0, %c0_i32 : i32, i32
  }
}

</mosaic_0001>

<bundles_post_ra>
// kernel: tpu_custom_call.1
= control target key start
LH: loop header
LB: loop body
LE: loop exit
PB: predicated region body
PF: predicated region fallthrough
CT: control target
= control target key end

     0   :  { %s3555_s0 = inlined_call_operand.hbm [shape: bf16[16,48,256], index: 0, kind: input, shape index: {}]   ;;  %s3556_s1 = inlined_call_operand.hbm [shape: bf16[16,48,128], index: 1, kind: input, shape index: {}]   ;;  %s3557_s2 = inlined_call_operand.hbm [shape: bf16[256,256], index: 2, kind: input, shape index: {}]   ;;  %s3558_s3 = inlined_call_operand.vmem [shape: f32[1,256], index: 3, kind: input, shape index: {}]   ;;  %s3559_s4 = inlined_call_operand.hbm [shape: bf16[128,256], index: 4, kind: input, shape index: {}]   ;;  %s3560_s5 = inlined_call_operand.vmem [shape: f32[1,256], index: 5, kind: input, shape index: {}]   ;;  %s3561_s6 = inlined_call_operand.hbm [shape: bf16[256,256], index: 6, kind: input, shape index: {}]   ;;  %s3562_s7 = inlined_call_operand.hbm [shape: bf16[256,256], index: 7, kind: input, shape index: {}]   ;;  %s3563_s8 = inlined_call_operand.hbm [shape: bf16[256,256], index: 8, kind: input, shape index: {}]   ;;  %s3564_s9 = inlined_call_operand.vmem [shape: f32[1,256], index: 9, kind: input, shape index: {}]   ;;  %s3565_s10 = inlined_call_operand.vmem [shape: f32[1,256], index: 10, kind: input, shape index: {}]   ;;  %s3566_s11 = inlined_call_operand.<no memory space> [shape: f32[1,1], index: 11, kind: input, shape index: {}]   ;;  %s3567_s12 = inlined_call_operand.vmem [shape: f32[16,1], index: 12, kind: output, shape index: {}]  }
   0x1   :  { %3576 = sst [smem:[#allocation23_spill]] %s3555_s0  ;;  %v17_v0 = vstv %s3566_s11 }
   0x2   :  { %3577 = sst [smem:[#allocation24_spill]] %s3557_s2  ;;  %18 = vst [vmem:[#allocation4] sm:$0x1] %v17_v0 }
   0x3   :  { %3578 = sst [smem:[#allocation25_spill]] %s3558_s3 }
   0x4   :  { %3579 = sst [smem:[#allocation26_spill]] %s3559_s4 }
   0x5   :  { %3580 = sst [smem:[#allocation27_spill]] %s3560_s5 }
   0x6   :  { %3581 = sst [smem:[#allocation28_spill]] %s3561_s6 }
   0x7   :  { %3582 = sst [smem:[#allocation29_spill]] %s3562_s7 }
   0x8   :  { %3583 = sst [smem:[#allocation30_spill]] %s3563_s8 }
   0x9   :  { %3584 = sst [smem:[#allocation31_spill]] %s3564_s9 }
   0xa   :  { %3585 = sst [smem:[#allocation32_spill]] %s3565_s10 }
   0xb   :  { %3586 = sst [smem:[#allocation33_spill]] %s3567_s12 }
   0xc   :  { %19 = vsyncpa [#allocation6], 0 }
   0xd   :  { %21 = vsyncpa [#allocation6 + $0x1], 0 }
   0xe   :  { %22 = vsyncpa [#allocation8], 0 }
   0xf   :  { %24 = vsyncpa [#allocation8 + $0x1], 0 }
  0x10   :  { %25 = vsyncpa [#allocation11], 0 }
  0x11   :  { %26 = vsyncpa [#allocation14], 0  ;;  %s3064_s23 = smov 0   ;;  %s3066_s24 = smov 0  }
  0x12   :  { %s3068_s25 = smov 0   ;;  %s3070_s26 = smov 0  }
  0x13   :  { %s3072_s27 = smov 0   ;;  %s3074_s28 = smov 0  }
  0x14   :  { %s3076_s11 = smov 0   ;;  %s3078_s29 = smov 0  }
  0x15 LB: > { %3587 = sst [smem:[#allocation21_spill]] %s2963_s26  ;;  %s3568_s30 = sadd.s32 4294967295, %s2979_s29   ;;  %s2979_s29 = sphi %s3078_s29, %s32_s29   ;;  %s2975_s11 = sphi %s3076_s11, %s3621_s11   ;;  %s2971_s28 = sphi %s3074_s28, %s3620_s28   ;;  %s2967_s27 = sphi %s3072_s27, %s3619_s27   ;;  %s2963_s26 = sphi %s3070_s26, %s3618_s26   ;;  %s2959_s25 = sphi %s3068_s25, %s3617_s25   ;;  %s2955_s24 = sphi %s3066_s24, %s3616_s24   ;;  %s2951_s23 = sphi %s3064_s23, %s3615_s23  }
  0x16   : > { %3588 = sst [smem:[#allocation22_spill]] %s2967_s27  ;;  %p66_p0 = scmp.ne.s32.totalorder %s2955_s24, %s2951_s23 }
  0x17   : > { %p3106_p1 = scmp.eq.s32.totalorder %s3568_s30, 0  ;;  %p2143_p2 = scmp.ge.s32.totalorder %s2979_s29, 1 }
  0x18   : > { %p341_p3 = scmp.lt.s32.totalorder %s2979_s29, 13  ;;  %s2981_s16 = smov [#allocation9]  }
  0x19   : > { %s3589_s13 = scalar_select %p3106_p1, 1, 0 }
  0x1a   : > { %p3114_p4 = por %p3106_p1, %p66_p0  ;;  %p3118_p5 = pnand %p2143_p2, %p341_p3 }
  0x1b   : > { %s353_s17 = sshll.u32 %s2981_s16, 4  ;;  %s2982_s19 = smov [#allocation10]   ;;  %s3122_s17 = int_to_ptr.vmem [resolvable:$true] %s353_s17 }
  0x1c   : > { %s3590_s14 = scalar_select %p3114_p4, 1, 0 }
  0x1d   : > { %s3591_s15 = scalar_select %p3118_p5, 1, 0 }
  0x1e   : > { %p2362_p6 = pneg %p3118_p5  ;;  %s369_s20 = sshll.u32 %s2982_s19, 4  ;;  %s3132_s20 = int_to_ptr.vmem [resolvable:$true] %s369_s20 }
  0x1f   : > { %s2983_s21 = smov [#allocation13]   ;;  %s3593_s2 = sld [smem:[#allocation24_spill]] }
  0x20   : > { %p3128_p7 = pnand %p2362_p6, %p3106_p1  ;;  %s3134_s22 = sshll.u32 %s2983_s21, 4  ;;  %s399_s22 = int_to_ptr.vmem [resolvable:$true] %s3134_s22 }
  0x22   : > { %p3144_p9 = pneg %p3128_p7 }
  0x25   : > { %s2697_s16 = scalar_lea.hbm %s3593_s2, 4096 }
  0x26   : > { %p2698_p8 = scmp.ne.s32.totalorder %s3593_s2, %s2697_s16  ;;  %p2704_p12 = scmp.lt.u32.totalorder %s2697_s16, %s3593_s2 }
  0x28   : > { %p2700_p10 = pnand %p3144_p9, %p2698_p8 }
  0x2a   : > { %p2701_p11 = pneg %p2700_p10 }
  0x2c   : > { %p2706_p13 = pnand %p2704_p12, %p2701_p11 }
  0x2e   : > { %2709 = shalt.err (!%p2706_p13)
}
  0x2f   : > { %s2710_s9 = scalar_lea.vmem %s3122_s17, 4096  ;;  %p2718_p6 = scmp.lt.s32.totalorder %s3122_s17, %s3122_s17 }
  0x30   : > { %p2711_p0 = scmp.ne.s32.totalorder %s3122_s17, %s2710_s9  ;;  %p2719_p1 = scmp.lt.s32.totalorder %s2710_s9, %s2710_s9 }
  0x32   : > { %p2713_p2 = pnand %p2711_p0, %p3144_p9  ;;  %p2720_p8 = por %p2719_p1, %p2718_p6 }
  0x34   : > { %p2714_p3 = pneg %p2713_p2 }
  0x36   : > { %p2721_p10 = pnand %p2720_p8, %p2714_p3 }
  0x38   : > { %2724 = shalt.err (!%p2721_p10)
}
  0x39   : > { %s3574_s10 = smov 128   ;;  %s3575_s30 = smov 8  }
  0x3a   : > { %2365 = dma.hbm_to_vmem [thread:$0]  (!%p3128_p7), %s3593_s2, 4096, %s3122_s17, [#allocation8], %s3574_s10, %s3574_s10, %s3575_s30  }
  0x3b   : > { %s3595_s4 = sld [smem:[#allocation26_spill]] }
  0x41   : > { %s2725_s9 = scalar_lea.hbm %s3595_s4, 2048 }
  0x42   : > { %p2726_p1 = scmp.ne.s32.totalorder %s3595_s4, %s2725_s9  ;;  %p2732_p13 = scmp.lt.u32.totalorder %s2725_s9, %s3595_s4 }
  0x44   : > { %p2728_p11 = pnand %p2726_p1, %p3144_p9 }
  0x46   : > { %p2729_p12 = pneg %p2728_p11 }
  0x48   : > { %p2734_p0 = pnand %p2732_p13, %p2729_p12 }
  0x4a   : > { %2737 = shalt.err (!%p2734_p0)
}
  0x4b   : > { %s2738_s17 = scalar_lea.vmem %s3132_s20, 2048  ;;  %p2746_p8 = scmp.lt.s32.totalorder %s3132_s20, %s3132_s20 }
  0x4c   : > { %p2739_p2 = scmp.ne.s32.totalorder %s3132_s20, %s2738_s17  ;;  %p2747_p10 = scmp.lt.s32.totalorder %s2738_s17, %s2738_s17 }
  0x4e   : > { %p2741_p3 = pnand %p2739_p2, %p3144_p9  ;;  %p2748_p1 = por %p2747_p10, %p2746_p8 }
  0x50   : > { %p2742_p6 = pneg %p2741_p3 }
  0x52   : > { %p2749_p11 = pnand %p2748_p1, %p2742_p6 }
  0x54   : > { %2752 = shalt.err (!%p2749_p11)
}
  0x55   : > { %2368 = dma.hbm_to_vmem [thread:$0]  (!%p3128_p7), %s3595_s4, 2048, %s3132_s20, [#allocation11], %s3574_s10, %s3574_s10, %s3575_s30  }
  0x56   : > { %s3596_s7 = sld [smem:[#allocation29_spill]] }
  0x5c   : > { %s2753_s23 = scalar_lea.hbm %s3596_s7, 4096 }
  0x5d   : > { %p2754_p12 = scmp.ne.s32.totalorder %s3596_s7, %s2753_s23  ;;  %p2760_p2 = scmp.lt.u32.totalorder %s2753_s23, %s3596_s7 }
  0x5f   : > { %p2756_p13 = pnand %p2754_p12, %p3144_p9 }
  0x61   : > { %p2757_p0 = pneg %p2756_p13 }
  0x63   : > { %p2762_p3 = pnand %p2760_p2, %p2757_p0 }
  0x65   : > { %2765 = shalt.err (!%p2762_p3)
}
  0x66   : > { %s2766_s17 = scalar_lea.vmem %s399_s22, 4096  ;;  %p2774_p1 = scmp.lt.s32.totalorder %s399_s22, %s399_s22 }
  0x67   : > { %p2767_p6 = scmp.ne.s32.totalorder %s399_s22, %s2766_s17  ;;  %p2775_p11 = scmp.lt.s32.totalorder %s2766_s17, %s2766_s17 }
  0x69   : > { %p2769_p8 = pnand %p2767_p6, %p3144_p9  ;;  %p2776_p4 = por %p2775_p11, %p2774_p1 }
  0x6b   : > { %p2770_p10 = pneg %p2769_p8 }
  0x6d   : > { %p2777_p5 = pnand %p2776_p4, %p2770_p10 }
  0x6f   : > { %2780 = shalt.err (!%p2777_p5)
}
  0x70   : > { %2374 = dma.hbm_to_vmem [thread:$0]  (!%p3128_p7), %s3596_s7, 4096, %s399_s22, [#allocation14], %s3574_s10, %s3574_s10, %s3575_s30  }
  0x71   : > { %s2986_s12 = smov [#allocation12]   ;;  %s2987_s27 = smov [#allocation15]  }
  0x72   : > { %s385_s26 = sshll.u32 %s2986_s12, 4  ;;  %s411_s23 = sshll.u32 %s2987_s27, 4  ;;  %s386_s26 = int_to_ptr.vmem [resolvable:$true] %s385_s26  ;;  %s412_s23 = int_to_ptr.vmem [resolvable:$true] %s411_s23 }
  0x73   : > { %s3597_s6 = sld [smem:[#allocation28_spill]] }
  0x79   : > { %s2781_s21 = scalar_lea.hbm %s3597_s6, 4096 }
  0x7a   : > { %p2782_p4 = scmp.ne.s32.totalorder %s3597_s6, %s2781_s21  ;;  %p2788_p13 = scmp.lt.u32.totalorder %s2781_s21, %s3597_s6 }
  0x7c   : > { %p2784_p5 = pnand %p2782_p4, %p3144_p9 }
  0x7e   : > { %p2785_p12 = pneg %p2784_p5 }
  0x80   : > { %p2790_p0 = pnand %p2788_p13, %p2785_p12 }
  0x82   : > { %2793 = shalt.err (!%p2790_p0)
}
  0x83   : > { %s2794_s22 = scalar_lea.vmem %s386_s26, 4096  ;;  %p2802_p8 = scmp.lt.s32.totalorder %s386_s26, %s386_s26 }
  0x84   : > { %p2795_p2 = scmp.ne.s32.totalorder %s386_s26, %s2794_s22  ;;  %p2803_p10 = scmp.lt.s32.totalorder %s2794_s22, %s2794_s22 }
  0x86   : > { %p2797_p3 = pnand %p2795_p2, %p3144_p9  ;;  %p2804_p1 = por %p2803_p10, %p2802_p8 }
  0x88   : > { %p2798_p6 = pneg %p2797_p3 }
  0x8a   : > { %p2805_p11 = pnand %p2804_p1, %p2798_p6 }
  0x8c   : > { %2808 = shalt.err (!%p2805_p11)
}
  0x8d   : > { %2371 = dma.hbm_to_vmem [thread:$0]  (!%p3128_p7), %s3597_s6, 4096, %s386_s26, [#allocation11], %s3574_s10, %s3574_s10, %s3575_s30  }
  0x8e   : > { %s3598_s8 = sld [smem:[#allocation30_spill]] }
  0x94   : > { %s2809_s16 = scalar_lea.hbm %s3598_s8, 4096 }
  0x95   : > { %p2810_p4 = scmp.ne.s32.totalorder %s3598_s8, %s2809_s16  ;;  %p2816_p13 = scmp.lt.u32.totalorder %s2809_s16, %s3598_s8 }
  0x97   : > { %p2812_p5 = pnand %p2810_p4, %p3144_p9 }
  0x99   : > { %p2813_p12 = pneg %p2812_p5 }
  0x9b   : > { %p2818_p0 = pnand %p2816_p13, %p2813_p12 }
  0x9d   : > { %2821 = shalt.err (!%p2818_p0)
}
  0x9e   : > { %s2822_s20 = scalar_lea.vmem %s412_s23, 4096  ;;  %p2830_p8 = scmp.lt.s32.totalorder %s412_s23, %s412_s23 }
  0x9f   : > { %p2823_p2 = scmp.ne.s32.totalorder %s412_s23, %s2822_s20  ;;  %p2831_p10 = scmp.lt.s32.totalorder %s2822_s20, %s2822_s20 }
  0xa1   : > { %p2825_p3 = pnand %p2823_p2, %p3144_p9  ;;  %p2832_p1 = por %p2831_p10, %p2830_p8 }
  0xa3   : > { %p2826_p6 = pneg %p2825_p3 }
  0xa5   : > { %p2833_p11 = pnand %p2832_p1, %p2826_p6 }
  0xa7   : > { %2836 = shalt.err (!%p2833_p11)
}
  0xa8   : > { %2377 = dma.hbm_to_vmem [thread:$0]  (!%p3128_p7), %s3598_s8, 4096, %s412_s23, [#allocation14], %s3574_s10, %s3574_s10, %s3575_s30  }
  0xa9   : > { %s41_s3 = sadd.s32 1, %s2971_s28  ;;  %s44_s18 = sadd.s32 1, %s2975_s11 }
  0xaa   : > { %p42_p9 = scmp.ge.s32.totalorder %s41_s3, 6  ;;  %s53_s2 = sadd.s32 1, %s2959_s25 }
  0xab   : > { %p60_p4 = scmp.ne.s32.totalorder %s2959_s25, %s2955_s24  ;;  %p61_p5 = scmp.eq.s32.totalorder %s2979_s29, 0 }
  0xac   : > { %s3623_s3 = smov (%p42_p9, %s41_s3), 0  ;;  %s3625_s18 = smov (!%p42_p9, %s44_s18), %s2975_s11 }
  0xad   : > { %s49_s5 = ssub.s32 %s2971_s28, %s3623_s3  ;;  %p46_p12 = scmp.ge.s32.totalorder %s3625_s18, 2 }
  0xae   : > { %p2390_p13 = scmp.lt.s32.totalorder %s2979_s29, 12  ;;  %p62_p0 = por %p61_p5, %p60_p4 }
  0xaf   : > { %s3271_s12 = sand.u32 1, %s2959_s25   ;;  %s3627_s18 = smov (%p46_p12, %s3625_s18), 0 }
  0xb0   : > { %s2150_s23 = sshll.u32 %s3271_s12, 6  ;;  %s48_s27 = ssub.s32 %s2975_s11, %s3627_s18 }
  0xb1   : > { %s50_s16 = sor.u32 %s49_s5, %s48_s27  ;;  %s2152_s19 = sshll.u32 %s2971_s28, 1 }
  0xb2   : > { %p51_p7 = scmp.eq.s32.totalorder %s50_s16, 0  ;;  %s2336_s21 = smul.u32 96, %s2975_s11 }
  0xb3   : > { %s438_s9 = scalar_lea.vmem [#allocation5], %s2150_s23  ;;  %p3280_p2 = pnand %p2390_p13, %p62_p0 }
  0xb4   : > { %s448_s17 = sshll.u32 %s438_s9, 4  ;;  %s445_s22 = sadd.s32 %s2336_s21, %s2152_s19  ;;  %s3287_s17 = int_to_ptr.vmem [resolvable:$true] %s448_s17 }
  0xb5   : > { %s3285_s26 = scalar_select %p51_p7, %s2959_s25, %s53_s2  }
  0xb6   : > { %s2154_s10 = sshll.u32 %s445_s22, 6  ;;  %s3600_s0 = sld [smem:[#allocation23_spill]] }
  0xb7   : > { %s435_s23 = scalar_lea.sflag [#allocation6], %s3271_s12  ;;  %p2839_p6 = pneg %p3280_p2 }
  0xbc   : > { %s3292_s5 = scalar_lea.hbm %s3600_s0, %s2154_s10  ;;  %s2842_s19 = scalar_lea.hbm %s3600_s0, 12288 }
  0xbd   : > { %s2837_s27 = scalar_lea.hbm %s3292_s5, 1024  ;;  %p2843_p1 = scmp.lt.u32.totalorder %s3292_s5, %s3600_s0 }
  0xbe   : > { %p2838_p3 = scmp.ne.s32.totalorder %s3292_s5, %s2837_s27  ;;  %p2844_p11 = scmp.lt.u32.totalorder %s2842_s19, %s2837_s27 }
  0xbf   : > { %p2846_p4 = scmp.lt.u32.totalorder %s2837_s27, %s3292_s5 }
  0xc0   : > { %p2840_p8 = pnand %p2839_p6, %p2838_p3  ;;  %p2845_p9 = por %p2844_p11, %p2843_p1 }
  0xc2   : > { %p2841_p10 = pneg %p2840_p8  ;;  %p2847_p5 = por %p2846_p4, %p2845_p9 }
  0xc4   : > { %p2848_p12 = pnand %p2847_p5, %p2841_p10 }
  0xc6   : > { %2851 = shalt.err (!%p2848_p12)
}
  0xc7   : > { %s2852_s30 = scalar_lea.vmem %s3287_s17, 1024  ;;  %s2988_s21 = smov [#allocation5]  }
  0xc8   : > { %p2853_p13 = scmp.ne.s32.totalorder %s3287_s17, %s2852_s30  ;;  %s2857_s9 = sshll.u32 %s2988_s21, 4  ;;  %s2858_s9 = int_to_ptr.vmem [resolvable:$false] %s2857_s9 }
  0xc9   : > { %s2859_s22 = scalar_lea.vmem %s2858_s9, 2048  ;;  %p2860_p3 = scmp.lt.s32.totalorder %s3287_s17, %s2858_s9 }
  0xca   : > { %p2855_p0 = pnand %p2853_p13, %p2839_p6  ;;  %p2861_p8 = scmp.lt.s32.totalorder %s2859_s22, %s2852_s30 }
  0xcc   : > { %p2856_p7 = pneg %p2855_p0  ;;  %p2862_p1 = por %p2861_p8, %p2860_p3 }
  0xce   : > { %p2863_p11 = pnand %p2862_p1, %p2856_p7 }
  0xd0   : > { %2866 = shalt.err (!%p2863_p11)
}
  0xd1   : > { %s2989_s27 = smov 768   ;;  %s3601_s2 = smov 8  }
  0xd2   : > { %s3602_s16 = smov 128   ;;  %s458_s19 = sand.u32 1, %s2979_s29  }
  0xd3   : > { %2381 = dma.hbm_to_vmem [thread:$0]  (!%p3280_p2), %s3292_s5, 1024, %s3287_s17, %s435_s23, %s2989_s27, %s3602_s16, %s3601_s2  }
  0xd4   : > { %s2155_s4 = sshll.u32 %s3271_s12, 5  ;;  %s2337_s10 = smul.u32 48, %s2975_s11 }
  0xd5   : > { %s462_s30 = scalar_lea.vmem [#allocation7], %s2155_s4  ;;  %s3335_s8 = scalar_lea.sflag [#allocation8], %s458_s19 }
  0xd6   : > { %s471_s21 = sshll.u32 %s462_s30, 4  ;;  %s468_s9 = sadd.s32 %s2971_s28, %s2337_s10  ;;  %s3327_s21 = int_to_ptr.vmem [resolvable:$true] %s471_s21 }
  0xd7   : > { %s2158_s22 = sshll.u32 %s468_s9, 6  ;;  %s2872_s23 = scalar_lea.hbm %s3556_s1, 6144 }
  0xd8   : > { %s3333_s7 = scalar_lea.hbm %s3556_s1, %s2158_s22 }
  0xd9   : > { %s2867_s17 = scalar_lea.hbm %s3333_s7, 512  ;;  %p2873_p5 = scmp.lt.u32.totalorder %s3333_s7, %s3556_s1 }
  0xda   : > { %p2868_p10 = scmp.ne.s32.totalorder %s3333_s7, %s2867_s17  ;;  %p2874_p12 = scmp.lt.u32.totalorder %s2872_s23, %s2867_s17 }
  0xdb   : > { %p2876_p0 = scmp.lt.u32.totalorder %s2867_s17, %s3333_s7 }
  0xdc   : > { %p2870_p9 = pnand %p2868_p10, %p2839_p6  ;;  %p2875_p13 = por %p2874_p12, %p2873_p5 }
  0xde   : > { %p2871_p4 = pneg %p2870_p9  ;;  %p2877_p7 = por %p2876_p0, %p2875_p13 }
  0xe0   : > { %p2878_p3 = pnand %p2877_p7, %p2871_p4 }
  0xe2   : > { %2881 = shalt.err (!%p2878_p3)
}
  0xe3   : > { %s2882_s6 = scalar_lea.vmem %s3327_s21, 512  ;;  %s2990_s2 = smov [#allocation7]  }
  0xe4   : > { %p2883_p8 = scmp.ne.s32.totalorder %s3327_s21, %s2882_s6  ;;  %s2887_s16 = sshll.u32 %s2990_s2, 4  ;;  %s2888_s16 = int_to_ptr.vmem [resolvable:$false] %s2887_s16 }
  0xe5   : > { %s2889_s19 = scalar_lea.vmem %s2888_s16, 1024  ;;  %p2890_p10 = scmp.lt.s32.totalorder %s3327_s21, %s2888_s16 }
  0xe6   : > { %p2885_p1 = pnand %p2883_p8, %p2839_p6  ;;  %p2891_p9 = scmp.lt.s32.totalorder %s2889_s19, %s2882_s6 }
  0xe8   : > { %p2886_p11 = pneg %p2885_p1  ;;  %p2892_p5 = por %p2891_p9, %p2890_p10 }
  0xea   : > { %p2893_p12 = pnand %p2892_p5, %p2886_p11 }
  0xec   : > { %2896 = shalt.err (!%p2893_p12)
}
  0xed   : > { %s2991_s4 = smov 384   ;;  %s2992_s10 = smov 64  }
  0xee   : > { %s2993_s30 = smov 4   ;;  %p3603_p6 = scmp.ne.s32.totalorder %s3591_s15, 0 }
  0xef   : > { %2384 = dma.hbm_to_vmem [thread:$0]  (!%p3280_p2), %s3333_s7, 512, %s3327_s21, %s3335_s8, %s2991_s4, %s2992_s10, %s2993_s30  }
  0xf0   : > { %483 = sbr.rel (%p3603_p6) target bundleno = 1010 (0x3f2), region = 68  ;;  %s485_s9 = sand.u32 (!%p3603_p6), 1, %s2955_s24  }
  0xf1   : > { %s2160_s22 = sshll.u32 (!%p3603_p6), %s485_s9, 6  ;;  %s486_s17 = scalar_lea.sflag (!%p3603_p6), [#allocation6], %s485_s9 }
  0xf2   : > { %s3364_s12 = scalar_lea.vmem (!%p3603_p6), [#allocation5], %s2160_s22  ;;  %p3604_p4 = scmp.ne.s32.totalorder (!%p3603_p6), %s3590_s14, 0 }
  0xf7   : > { %2930 = dma.done.wait (%p3604_p4), %s486_s17, 1024  }
  0xf8   : > { %2932 = vsyncadd (%p3604_p4), %s486_s17, 4294966272  ;;  %s3605_s5 = sadd.s32 4294967295, %s2979_s29   ;;  %s2161_s7 = sshll.u32 %s485_s9, 5 }
  0xf9   : > { %s494_s20 = sand.u32 1, %s3605_s5   ;;  %s3372_s15 = scalar_lea.vmem [#allocation7], %s2161_s7 }
  0xfa   : > { %s495_s8 = scalar_lea.sflag [#allocation8], %s494_s20 }
  0xfb   : > { %2934 = dma.done.wait (%p3604_p4), %s495_s8, 512  }
  0xfc   : > { %2936 = vsyncadd (%p3604_p4), %s495_s8, 4294966784  ;;  %p3606_p2 = scmp.ne.s32.totalorder %s3589_s13, 0 }
  0xfe   : > { %2938 = dma.done.wait (%p3606_p2), [#allocation8], 4096  }
  0xff   : > { %2940 = vsyncadd (%p3606_p2), [#allocation8], 4294963200 }
 0x100   : > { %2942 = dma.done.wait (%p3606_p2), [#allocation11], 6144  }
 0x101   : > { %2944 = vsyncadd (%p3606_p2), [#allocation11], 4294961152 }
 0x102   : > { %2946 = dma.done.wait (%p3606_p2), [#allocation14], 8192  }
 0x103   : > { %2948 = vsyncadd (%p3606_p2), [#allocation14], 4294959104  ;;  %s3607_s14 = sld [smem:[#allocation22_spill]]  ;;  %s3608_s0 = sld [smem:[#allocation33_spill]] }
 0x104   : > { %s3609_s2 = sld [smem:[#allocation21_spill]] }
 0x109   : > { %p565_p13 = scmp.lt.s32.totalorder %s3607_s14, 1 }
 0x10a   : > { %p2168_p0 = scmp.ne.s32.totalorder %s3609_s2, 0 }
 0x10b   : > { %s3629_s14 = smov (!%p565_p13, %s3607_s14), 1  ;;  %v2994_v1 = vmov (!%p2168_p0), 0.0  }
 0x10c   : > { %s2167_s21 = sshll.u32 %s3629_s14, 3  ;;  %573 = sbr.rel (%p2168_p0) target bundleno = 275 (0x113), region = 100  ;;  %574 = vst [vmem:[#allocation2] sm:$0xff] (!%p2168_p0), %v2994_v1  ;;  %575 = vst [vmem:[#allocation2 + $0x8] sm:$0xff] (!%p2168_p0), %v2994_v1 }
 0x10d   : > { %s3395_s6 = scalar_lea.vmem %s3608_s0, %s2167_s21  ;;  %576 = vst [vmem:[#allocation3] sm:$0xff] (!%p2168_p0), %v2994_v1 }
 0x113 PF: > { %v579_v2 = vld [vmem:[%s3364_s12] sm:$0xff]  ;;  %v580_v3 = vld [vmem:[%s3364_s12 + $0x8] sm:$0xff]  ;;  %v581_v4 = vld [vmem:[%s3364_s12 + $0x10] sm:$0xff]  ;;  %vm715_vm0 = vcmask 1041409   ;;  %vm717_vm1 = vcmask 1042434   ;;  %vm719_vm2 = vcmask 1043459  }
 0x114   : > { %v582_v5 = vld [vmem:[%s3364_s12 + $0x18] sm:$0xff]  ;;  %v587_v6 = vunpack.c.l.bf16 %v579_v2  ;;  %v588_v7 = vunpack.c.h.bf16 %v579_v2  ;;  %v3403_v8 = vld [vmem:[%s3364_s12 + $0x20] sm:$0xff]  ;;  %v3406_v9 = vld [vmem:[%s3364_s12 + $0x28] sm:$0xff]  ;;  %v589_v11 = vunpack.c.l.bf16 %v580_v3  ;;  %v590_v12 = vunpack.c.h.bf16 %v580_v3  ;;  %s3610_s13 = sld [smem:[#allocation21_spill]] }
 0x115   : > { %v3409_v10 = vld [vmem:[%s3364_s12 + $0x30] sm:$0xff]  ;;  %v591_v13 = vunpack.c.l.bf16 %v581_v4  ;;  %v592_v14 = vunpack.c.h.bf16 %v581_v4  ;;  %v3412_v15 = vld [vmem:[%s3364_s12 + $0x38] sm:$0xff]  ;;  %v593_v16 = vunpack.c.l.bf16 %v582_v5  ;;  %v594_v17 = vunpack.c.h.bf16 %v582_v5 }
 0x116   : > { %v595_v18 = vunpack.c.l.bf16 %v3403_v8  ;;  %v596_v19 = vunpack.c.h.bf16 %v3403_v8  ;;  %v597_v20 = vunpack.c.l.bf16 %v3406_v9  ;;  %v598_v21 = vunpack.c.h.bf16 %v3406_v9 }
 0x117   : > { %v599_v22 = vunpack.c.l.bf16 %v3409_v10  ;;  %v600_v23 = vunpack.c.h.bf16 %v3409_v10  ;;  %v601_v24 = vunpack.c.l.bf16 %v3412_v15  ;;  %v602_v25 = vunpack.c.h.bf16 %v3412_v15 }
 0x118   : > { %v603_v26 = vrot.slane %v587_v6, 4  ;;  %v609_v27 = vrot.slane %v588_v7, 4  ;;  %v615_v28 = vrot.slane %v589_v11, 4  ;;  %v621_v29 = vrot.slane %v590_v12, 4 }
 0x119   : > { %v627_v30 = vrot.slane %v591_v13, 4  ;;  %v633_v31 = vrot.slane %v592_v14, 4  ;;  %v639_v34 = vrot.slane %v593_v16, 4  ;;  %v645_v35 = vrot.slane %v594_v17, 4 }
 0x11a   : > { %v604_v32 = vadd.f32 %v603_v26, %v587_v6  ;;  %v610_v33 = vadd.f32 %v609_v27, %v588_v7  ;;  %v616_v36 = vadd.f32 %v615_v28, %v589_v11  ;;  %v622_v37 = vadd.f32 %v621_v29, %v590_v12  ;;  %p2169_p7 = scmp.ne.s32.totalorder %s3610_s13, 5 }
 0x11b   : > { %v628_v38 = vadd.f32 %v627_v30, %v591_v13  ;;  %v634_v39 = vadd.f32 %v633_v31, %v592_v14  ;;  %v640_v42 = vadd.f32 %v639_v34, %v593_v16  ;;  %v646_v43 = vadd.f32 %v645_v35, %v594_v17  ;;  %s3611_s4 = sld [smem:[#allocation27_spill]] (!%p2169_p7)  ;;  %s3612_s9 = sld [smem:[#allocation25_spill]] (!%p2169_p7) }
 0x11c   : > { %v605_v40 = vrot.slane %v604_v32, 2  ;;  %v611_v41 = vrot.slane %v610_v33, 2  ;;  %v617_v44 = vrot.slane %v616_v36, 2  ;;  %v623_v45 = vrot.slane %v622_v37, 2  ;;  %s3613_s12 = sld [smem:[#allocation31_spill]] (!%p2169_p7)  ;;  %s3614_s7 = sld [smem:[#allocation32_spill]] (!%p2169_p7) }
 0x11d   : > { %v629_v46 = vrot.slane %v628_v38, 2  ;;  %v635_v47 = vrot.slane %v634_v39, 2  ;;  %v641_v50 = vrot.slane %v640_v42, 2  ;;  %v647_v51 = vrot.slane %v646_v43, 2 }
 0x11e   : > { %v606_v48 = vadd.f32 %v605_v40, %v604_v32  ;;  %v612_v49 = vadd.f32 %v611_v41, %v610_v33  ;;  %v618_v52 = vadd.f32 %v617_v44, %v616_v36  ;;  %v624_v53 = vadd.f32 %v623_v45, %v622_v37 }
 0x11f   : > { %v630_v54 = vadd.f32 %v629_v46, %v628_v38  ;;  %v636_v55 = vadd.f32 %v635_v47, %v634_v39  ;;  %v642_v58 = vadd.f32 %v641_v50, %v640_v42  ;;  %v648_v59 = vadd.f32 %v647_v51, %v646_v43 }
 0x120   : > { %v607_v56 = vrot.slane %v606_v48, 1  ;;  %v613_v57 = vrot.slane %v612_v49, 1  ;;  %v619_v60 = vrot.slane %v618_v52, 1  ;;  %v625_v61 = vrot.slane %v624_v53, 1 }
 0x121   : > { %v631_v62 = vrot.slane %v630_v54, 1  ;;  %v637_v63 = vrot.slane %v636_v55, 1  ;;  %v643_v2 = vrot.slane %v642_v58, 1  ;;  %v649_v3 = vrot.slane %v648_v59, 1 }
 0x122   : > { %v3422_v0 = vadd.f32 %v607_v56, %v606_v48  ;;  %v3424_v1 = vadd.f32 %v613_v57, %v612_v49  ;;  %v620_v4 = vadd.f32 %v619_v60, %v618_v52  ;;  %v3426_v5 = vadd.f32 %v625_v61, %v624_v53  ;;  %v2318_v52 = vld [vmem:[%s3372_s15] sm:$0xff]   ;;  %v2333_v57 = vld [vmem:[%s3372_s15 + $0x8] sm:$0xff]   ;;  %v2334_v61 = vld [vmem:[%s3372_s15 + $0x10] sm:$0xff]  }
 0x123   : > { %v3428_v6 = vadd.f32 %v631_v62, %v630_v54  ;;  %v3430_v7 = vadd.f32 %v637_v63, %v636_v55  ;;  %v3432_v11 = vadd.f32 %v643_v2, %v642_v58  ;;  %v3434_v12 = vadd.f32 %v649_v3, %v648_v59  ;;  %v2335_v3 = vld [vmem:[%s3372_s15 + $0x18] sm:$0xff]  }
 0x124   : > { %v651_v13 = vrot.slane %v595_v18, 4  ;;  %v657_v14 = vrot.slane %v596_v19, 4  ;;  %v663_v16 = vrot.slane %v597_v20, 4  ;;  %v669_v17 = vrot.slane %v598_v21, 4 }
 0x125   : > { %v675_v26 = vrot.slane %v599_v22, 4  ;;  %v681_v27 = vrot.slane %v600_v23, 4  ;;  %v687_v30 = vrot.slane %v601_v24, 4  ;;  %v693_v31 = vrot.slane %v602_v25, 4 }
 0x126   : > { %v652_v28 = vadd.f32 %v651_v13, %v595_v18  ;;  %v658_v29 = vadd.f32 %v657_v14, %v596_v19  ;;  %v664_v32 = vadd.f32 %v663_v16, %v597_v20  ;;  %v670_v33 = vadd.f32 %v669_v17, %v598_v21 }
 0x127   : > { %v676_v34 = vadd.f32 %v675_v26, %v599_v22  ;;  %v682_v8 = vadd.f32 %v681_v27, %v600_v23  ;;  %v688_v35 = vadd.f32 %v687_v30, %v601_v24  ;;  %v694_v36 = vadd.f32 %v693_v31, %v602_v25  ;;  %v577_v27 = vld [vmem:[#allocation2] sm:$0xff] }
 0x128   : > { %v653_v18 = vrot.slane %v652_v28, 2  ;;  %v659_v19 = vrot.slane %v658_v29, 2  ;;  %vm721_vm3 = vcmask 1044484   ;;  %v665_v20 = vrot.slane %v664_v32, 2 }
 0x129   : > { %v671_v37 = vrot.slane %v670_v33, 2  ;;  %v677_v9 = vrot.slane %v676_v34, 2  ;;  %v683_v21 = vrot.slane %v682_v8, 2  ;;  %vm723_vm4 = vcmask 1045509  }
 0x12a   : > { %v654_v38 = vadd.f32 %v653_v18, %v652_v28  ;;  %v660_v22 = vadd.f32 %v659_v19, %v658_v29  ;;  %v689_v39 = vrot.slane %v688_v35, 2  ;;  %v695_v10 = vrot.slane %v694_v36, 2 }
 0x12b   : > { %v666_v23 = vadd.f32 %v665_v20, %v664_v32  ;;  %v672_v40 = vadd.f32 %v671_v37, %v670_v33  ;;  %v678_v41 = vadd.f32 %v677_v9, %v676_v34  ;;  %v684_v42 = vadd.f32 %v683_v21, %v682_v8 }
 0x12c   : > { %v655_v43 = vrot.slane %v654_v38, 1  ;;  %v661_v24 = vrot.slane %v660_v22, 1  ;;  %v690_v15 = vadd.f32 %v689_v39, %v688_v35  ;;  %v696_v25 = vadd.f32 %v695_v10, %v694_v36 }
 0x12d   : > { %v667_v44 = vrot.slane %v666_v23, 1  ;;  %v673_v45 = vrot.slane %v672_v40, 1  ;;  %v679_v46 = vrot.slane %v678_v41, 1  ;;  %v685_v47 = vrot.slane %v684_v42, 1 }
 0x12e   : > { %v656_v48 = vadd.f32 %v655_v43, %v654_v38  ;;  %v662_v49 = vadd.f32 %v661_v24, %v660_v22  ;;  %v691_v50 = vrot.slane %v690_v15, 1  ;;  %v697_v51 = vrot.slane %v696_v25, 1 }
 0x12f   : > { %v668_v53 = vadd.f32 %v667_v44, %v666_v23  ;;  %v674_v54 = vadd.f32 %v673_v45, %v672_v40  ;;  %v680_v55 = vadd.f32 %v679_v46, %v678_v41  ;;  %v686_v56 = vadd.f32 %v685_v47, %v684_v42 }
 0x130   : > { %v692_v58 = vadd.f32 %v691_v50, %v690_v15  ;;  %v698_v59 = vadd.f32 %v697_v51, %v696_v25  ;;  %v716_v60 = vsel %vm715_vm0, %v620_v4, %v3422_v0  ;;  %vm725_vm5 = vcmask 1046534  }
 0x131   : > { %v718_v62 = vsel %vm717_vm1, %v3428_v6, %v716_v60  ;;  %vm727_vm6 = vcmask 1047559   ;;  %v729_v63 = vsel %vm715_vm0, %v3426_v5, %v3424_v1  ;;  %v2319_v2 = vunpack.c.l.bf16 %v2318_v52 }
 0x132   : > { %v720_v13 = vsel %vm719_vm2, %v3432_v11, %v718_v62  ;;  %v730_v14 = vsel %vm717_vm1, %v3430_v7, %v729_v63  ;;  %v2320_v16 = vunpack.c.h.bf16 %v2318_v52  ;;  %v2323_v0 = vunpack.c.l.bf16 %v2333_v57  ;;  %v578_v11 = vld [vmem:[#allocation2 + $0x8] sm:$0xff] }
 0x133   : > { %v722_v4 = vsel %vm721_vm3, %v656_v48, %v720_v13  ;;  %v731_v6 = vsel %vm719_vm2, %v3434_v12, %v730_v14  ;;  %v2324_v17 = vunpack.c.h.bf16 %v2333_v57  ;;  %v2327_v26 = vunpack.c.l.bf16 %v2334_v61 }
 0x134   : > { %v724_v1 = vsel %vm723_vm4, %v668_v53, %v722_v4  ;;  %v732_v5 = vsel %vm721_vm3, %v662_v49, %v731_v6  ;;  %v2328_v28 = vunpack.c.h.bf16 %v2334_v61  ;;  %v2331_v29 = vunpack.c.l.bf16 %v2335_v3 }
 0x135   : > { %v726_v30 = vsel %vm725_vm5, %v680_v55, %v724_v1  ;;  %v733_v7 = vsel %vm723_vm4, %v674_v54, %v732_v5  ;;  %v2332_v31 = vunpack.c.h.bf16 %v2335_v3  ;;  %v759_v32 = vrot.slane %v2319_v2, 4  ;;  %v742_v5 = vld [vmem:[#allocation3] sm:$0xff] }
 0x136   : > { %v728_v33 = vsel %vm727_vm6, %v692_v58, %v726_v30  ;;  %v734_v12 = vsel %vm725_vm5, %v686_v56, %v733_v7  ;;  %v765_v34 = vrot.slane %v2320_v16, 4  ;;  %v771_v8 = vrot.slane %v2323_v0, 4  ;;  %v2473_v7 = vld [vmem:[#allocation9 + $0x4] ss:$8 sps:$4 sm:$0xff] (!%p2169_p7)  }
 0x137   : > { %v735_v18 = vsel %vm727_vm6, %v698_v59, %v734_v12  ;;  %v738_v19 = vadd.f32 %v728_v33, %v577_v27  ;;  %v760_v35 = vadd.f32 %v2319_v2, %v759_v32  ;;  %v777_v36 = vrot.slane %v2324_v17, 4  ;;  %1042 = vmatprep.subr.bf16.mxu0 (!%p2169_p7), %v2473_v7  ;;  %v2477_v33 = vld [vmem:[#allocation9] ss:$8 sps:$4 sm:$0xff] (!%p2169_p7)  }
 0x138   : > { %v739_v20 = vadd.f32 %v735_v18, %v578_v11  ;;  %v766_v37 = vadd.f32 %v2320_v16, %v765_v34  ;;  %v772_v9 = vadd.f32 %v2323_v0, %v771_v8  ;;  %v783_v21 = vrot.slane %v2327_v26, 4  ;;  %v2478_v12 = vld [vmem:[#allocation10] ss:$8 sps:$4 sm:$0xff] (!%p2169_p7)   ;;  %v2479_v34 = vld [vmem:[#allocation9 + $0x14] ss:$8 sps:$4 sm:$0xff] (!%p2169_p7)   ;;  %1043 = vmatpush1.bf16.msra.mxu0 (!%p2169_p7), %v2477_v33 }
 0x139   : > { %740 = vst [vmem:[#allocation2] sm:$0xff] %v738_v19  ;;  %v761_v38 = vrot.slane %v760_v35, 2  ;;  %v778_v22 = vadd.f32 %v2324_v17, %v777_v36  ;;  %v789_v39 = vrot.slane %v2328_v28, 4  ;;  %v795_v10 = vrot.slane %v2331_v29, 4  ;;  %v2481_v8 = vld [vmem:[#allocation10 + $0x14] ss:$8 sps:$4 sm:$0xff] (!%p2169_p7)   ;;  %1044 = vmatprep.subr.bf16.mxu0 (!%p2169_p7), %v2479_v34 }
 0x13a   : > { %741 = vst [vmem:[#allocation2 + $0x8] sm:$0xff] %v739_v20  ;;  %v767_v23 = vrot.slane %v766_v37, 2  ;;  %v773_v40 = vrot.slane %v772_v9, 2  ;;  %v784_v41 = vadd.f32 %v2327_v26, %v783_v21  ;;  %v801_v42 = vrot.slane %v2332_v31, 4  ;;  %v2483_v18 = vld [vmem:[#allocation9 + $0x10] ss:$8 sps:$4 sm:$0xff] (!%p2169_p7)  }
 0x13b   : > { %v762_v43 = vadd.f32 %v761_v38, %v760_v35  ;;  %v779_v24 = vrot.slane %v778_v22, 2  ;;  %v790_v15 = vadd.f32 %v2328_v28, %v789_v39  ;;  %v796_v25 = vadd.f32 %v2331_v29, %v795_v10  ;;  %v2484_v19 = vld [vmem:[#allocation10 + $0x10] ss:$8 sps:$4 sm:$0xff] (!%p2169_p7)   ;;  %v2485_v35 = vld [vmem:[#allocation9 + $0x24] ss:$8 sps:$4 sm:$0xff] (!%p2169_p7)  }
 0x13c   : > { %v768_v44 = vadd.f32 %v767_v23, %v766_v37  ;;  %v774_v45 = vadd.f32 %v773_v40, %v772_v9  ;;  %v785_v46 = vrot.slane %v784_v41, 2  ;;  %v802_v47 = vadd.f32 %v2332_v31, %v801_v42  ;;  %v2475_v31 = vld [vmem:[#allocation10 + $0x4] ss:$8 sps:$4 sm:$0xff] (!%p2169_p7)   ;;  %v2489_v20 = vld [vmem:[#allocation9 + $0x20] ss:$8 sps:$4 sm:$0xff] (!%p2169_p7)   ;;  %1045 = vmatpush1.bf16.msra.mxu0 (!%p2169_p7), %v2483_v18 }
 0x13d   : > { %v763_v48 = vrot.slane %v762_v43, 1  ;;  %v780_v49 = vadd.f32 %v779_v24, %v778_v22  ;;  %v791_v50 = vrot.slane %v790_v15, 2  ;;  %v797_v51 = vrot.slane %v796_v25, 2  ;;  %1193 = vmatprep.subr.bf16.mxu1 (!%p2169_p7), %v2475_v31  ;;  %v2487_v36 = vld [vmem:[#allocation10 + $0x24] ss:$8 sps:$4 sm:$0xff] (!%p2169_p7)   ;;  %1046 = vmatprep.subr.bf16.mxu0 (!%p2169_p7), %v2485_v35 }
 0x13e   : > { %v769_v52 = vrot.slane %v768_v44, 1  ;;  %v775_v53 = vrot.slane %v774_v45, 1  ;;  %v786_v54 = vadd.f32 %v785_v46, %v784_v41  ;;  %v803_v55 = vrot.slane %v802_v47, 2  ;;  %1194 = vmatpush1.bf16.msra.mxu1 (!%p2169_p7), %v2478_v12  ;;  %v2490_v37 = vld [vmem:[#allocation10 + $0x20] ss:$8 sps:$4 sm:$0xff] (!%p2169_p7)  }
 0x13f   : > { %v764_v56 = vadd.f32 %v763_v48, %v762_v43  ;;  %v781_v57 = vrot.slane %v780_v49, 1  ;;  %v792_v58 = vadd.f32 %v791_v50, %v790_v15  ;;  %v798_v59 = vadd.f32 %v797_v51, %v796_v25  ;;  %1195 = vmatprep.subr.bf16.mxu1 (!%p2169_p7), %v2481_v8  ;;  %v2491_v9 = vld [vmem:[#allocation9 + $0x34] ss:$8 sps:$4 sm:$0xff] (!%p2169_p7)   ;;  %v2495_v38 = vld [vmem:[#allocation9 + $0x30] ss:$8 sps:$4 sm:$0xff] (!%p2169_p7)  }
 0x140   : > { %v770_v60 = vadd.f32 %v769_v52, %v768_v44  ;;  %v776_v61 = vadd.f32 %v775_v53, %v774_v45  ;;  %v787_v62 = vrot.slane %v786_v54, 1  ;;  %v804_v63 = vadd.f32 %v803_v55, %v802_v47  ;;  %v2493_v21 = vld [vmem:[#allocation10 + $0x34] ss:$8 sps:$4 sm:$0xff] (!%p2169_p7)   ;;  %1047 = vmatpush1.bf16.msra.mxu0 (!%p2169_p7), %v2489_v20  ;;  %v2496_v22 = vld [vmem:[#allocation10 + $0x30] ss:$8 sps:$4 sm:$0xff] (!%p2169_p7)   ;;  %v829_v7 = vld [vmem:[#allocation2] sm:$0xff] (!%p2169_p7) }
 0x141   : > { %v782_v2 = vadd.f32 %v781_v57, %v780_v49  ;;  %v793_v3 = vrot.slane %v792_v58, 1  ;;  %v799_v13 = vrot.slane %v798_v59, 1  ;;  %v2995_v32 = vmov (!%p2169_p7), 0   ;;  %v2497_v39 = vld [vmem:[#allocation9 + $0x44] ss:$8 sps:$4 sm:$0xff] (!%p2169_p7)   ;;  %1048 = vmatprep.subr.bf16.mxu0 (!%p2169_p7), %v2491_v9 }
 0x142   : > { %v788_v14 = vadd.f32 %v787_v62, %v786_v54  ;;  %v805_v16 = vrot.slane %v804_v63, 1  ;;  %v815_v0 = vsel %vm715_vm0, %v770_v60, %v764_v56  ;;  %1225 = vmatprep.mubr.bf16.mxu1 (!%p2169_p7), %v2995_v32  ;;  %1196 = vmatpush1.bf16.msra.mxu1 (!%p2169_p7), %v2484_v19  ;;  %v2499_v10 = vld [vmem:[#allocation10 + $0x44] ss:$8 sps:$4 sm:$0xff] (!%p2169_p7)   ;;  %v2501_v23 = vld [vmem:[#allocation9 + $0x40] ss:$8 sps:$4 sm:$0xff] (!%p2169_p7)   ;;  %vm1988_vm7 = vcmask (!%p2169_p7), 7168  }
 0x143   : > { %v794_v4 = vadd.f32 %v793_v3, %v792_v58  ;;  %v800_v6 = vadd.f32 %v799_v13, %v798_v59  ;;  %v816_v17 = vsel %vm717_vm1, %v776_v61, %v815_v0  ;;  %1197 = vmatprep.subr.bf16.mxu1 (!%p2169_p7), %v2487_v36  ;;  %v2502_v40 = vld [vmem:[#allocation10 + $0x40] ss:$8 sps:$4 sm:$0xff] (!%p2169_p7)   ;;  %v2503_v41 = vld [vmem:[#allocation9 + $0x54] ss:$8 sps:$4 sm:$0xff] (!%p2169_p7)   ;;  %v2507_v43 = vld [vmem:[#allocation9 + $0x50] ss:$8 sps:$4 sm:$0xff] (!%p2169_p7)  }
 0x144   : > { %v806_v26 = vadd.f32 %v805_v16, %v804_v63  ;;  %v817_v27 = vsel %vm719_vm2, %v782_v2, %v816_v17  ;;  %1049 = vmatpush1.bf16.msra.mxu0 (!%p2169_p7), %v2495_v38  ;;  %v2505_v42 = vld [vmem:[#allocation10 + $0x54] ss:$8 sps:$4 sm:$0xff] (!%p2169_p7)   ;;  %v2508_v24 = vld [vmem:[#allocation10 + $0x50] ss:$8 sps:$4 sm:$0xff] (!%p2169_p7)   ;;  %v2509_v15 = vld [vmem:[#allocation9 + $0x64] ss:$8 sps:$4 sm:$0xff] (!%p2169_p7)  }
 0x145   : > { %v818_v1 = vsel %vm721_vm3, %v788_v14, %v817_v27  ;;  %828 = sbr.rel (%p2169_p7) target bundleno = 1010 (0x3f2), region = 104  ;;  %1050 = vmatprep.subr.bf16.mxu0 (!%p2169_p7), %v2497_v39  ;;  %v2511_v25 = vld [vmem:[#allocation10 + $0x64] ss:$8 sps:$4 sm:$0xff] (!%p2169_p7)   ;;  %v2513_v44 = vld [vmem:[#allocation9 + $0x60] ss:$8 sps:$4 sm:$0xff] (!%p2169_p7)  }
 0x146   : > { %v819_v28 = vsel %vm723_vm4, %v794_v4, %v818_v1  ;;  %1198 = vmatpush1.bf16.msra.mxu1 (!%p2169_p7), %v2490_v37  ;;  %v2514_v45 = vld [vmem:[#allocation10 + $0x60] ss:$8 sps:$4 sm:$0xff] (!%p2169_p7)   ;;  %v2515_v47 = vld [vmem:[#allocation9 + $0x74] ss:$8 sps:$4 sm:$0xff] (!%p2169_p7)   ;;  %v2519_v49 = vld [vmem:[#allocation9 + $0x70] ss:$8 sps:$4 sm:$0xff] (!%p2169_p7)  }
 0x147   : > { %v820_v29 = vsel %vm725_vm5, %v800_v6, %v819_v28  ;;  %1199 = vmatprep.subr.bf16.mxu1 (!%p2169_p7), %v2493_v21  ;;  %v2517_v48 = vld [vmem:[#allocation10 + $0x74] ss:$8 sps:$4 sm:$0xff] (!%p2169_p7)   ;;  %v2520_v51 = vld [vmem:[#allocation10 + $0x70] ss:$8 sps:$4 sm:$0xff] (!%p2169_p7)   ;;  %v2521_v52 = vld [vmem:[#allocation9 + $0x84] ss:$8 sps:$4 sm:$0xff] (!%p2169_p7)  }
 0x148   : > { %v821_v11 = vsel %vm727_vm6, %v806_v26, %v820_v29  ;;  %1051 = vmatpush1.bf16.msra.mxu0 (!%p2169_p7), %v2501_v23  ;;  %v2523_v54 = vld [vmem:[#allocation9 + $0x80] ss:$8 sps:$4 sm:$0xff] (!%p2169_p7)   ;;  %v830_v55 = vld [vmem:[#allocation2 + $0x8] sm:$0xff] (!%p2169_p7)  ;;  %v831_v18 = vmul.f32 (!%p2169_p7), 0.020833334, %v829_v7 }
 0x149   : > { %v823_v30 = vadd.f32 %v821_v11, %v742_v5  ;;  %1052 = vmatprep.subr.bf16.mxu0 (!%p2169_p7), %v2503_v41  ;;  %v2524_v56 = vld [vmem:[#allocation9 + $0x94] ss:$8 sps:$4 sm:$0xff] (!%p2169_p7)   ;;  %v832_v57 = vmul.f32 (!%p2169_p7), 0.020833334, %v830_v55  ;;  %v2545_v58 = vld [vmem:[#allocation13] ss:$8 sps:$4 sm:$0xff] (!%p2169_p7)  }
 0x14a   : > { %1200 = vmatpush1.bf16.msra.mxu1 (!%p2169_p7), %v2496_v22  ;;  %v2547_v59 = vld [vmem:[#allocation13 + $0x4] ss:$8 sps:$4 sm:$0xff] (!%p2169_p7)   ;;  %v2550_v61 = vld [vmem:[#allocation13 + $0x14] ss:$8 sps:$4 sm:$0xff] (!%p2169_p7)   ;;  %v2526_v62 = vld [vmem:[#allocation9 + $0x90] ss:$8 sps:$4 sm:$0xff] (!%p2169_p7)   ;;  %v833_v37 = vpack.c.bf16 (!%p2169_p7), %v831_v18, %v831_v18 }
 0x14b   : > { %824 = vst [vmem:[#allocation3] sm:$0xff] %v823_v30  ;;  %1201 = vmatprep.subr.bf16.mxu1 (!%p2169_p7), %v2499_v10  ;;  %v834_v60 = vpack.c.bf16 (!%p2169_p7), %v832_v57, %v832_v57  ;;  %v2527_v63 = vld [vmem:[#allocation9 + $0xa4] ss:$8 sps:$4 sm:$0xff] (!%p2169_p7)   ;;  %v2548_v2 = vld [vmem:[#allocation13 + $0x10] ss:$8 sps:$4 sm:$0xff] (!%p2169_p7)  }
 0x14c   : > { %1053 = vmatpush1.bf16.msra.mxu0 %v2507_v43  ;;  %v2553_v3 = vld [vmem:[#allocation13 + $0x24] ss:$8 sps:$4 sm:$0xff]   ;;  %v2529_v13 = vld [vmem:[#allocation9 + $0xa0] ss:$8 sps:$4 sm:$0xff]   ;;  %v2530_v14 = vld [vmem:[#allocation9 + $0xb4] ss:$8 sps:$4 sm:$0xff]  }
 0x14d   : > { %1054 = vmatprep.subr.bf16.mxu0 %v2509_v15  ;;  %1074 = vmatprep.mubr.bf16.mxu0 %v834_v60  ;;  %v2551_v16 = vld [vmem:[#allocation13 + $0x20] ss:$8 sps:$4 sm:$0xff]   ;;  %v2556_v0 = vld [vmem:[#allocation13 + $0x34] ss:$8 sps:$4 sm:$0xff]   ;;  %v2532_v4 = vld [vmem:[#allocation9 + $0xb0] ss:$8 sps:$4 sm:$0xff]  }
 0x14e   : > { %1202 = vmatpush1.bf16.msra.mxu1 %v2502_v40  ;;  %v2533_v6 = vld [vmem:[#allocation9 + $0xc4] ss:$8 sps:$4 sm:$0xff]   ;;  %v2554_v17 = vld [vmem:[#allocation13 + $0x30] ss:$8 sps:$4 sm:$0xff]   ;;  %v2535_v27 = vld [vmem:[#allocation9 + $0xc0] ss:$8 sps:$4 sm:$0xff]  }
 0x14f   : > { %1203 = vmatprep.subr.bf16.mxu1 %v2505_v42  ;;  %v2559_v26 = vld [vmem:[#allocation13 + $0x44] ss:$8 sps:$4 sm:$0xff]   ;;  %v2536_v1 = vld [vmem:[#allocation9 + $0xd4] ss:$8 sps:$4 sm:$0xff]   ;;  %v2557_v5 = vld [vmem:[#allocation13 + $0x40] ss:$8 sps:$4 sm:$0xff]  }
 0x150   : > { %1055 = vmatpush1.bf16.msra.mxu0 %v2513_v44  ;;  %v2562_v28 = vld [vmem:[#allocation13 + $0x54] ss:$8 sps:$4 sm:$0xff]   ;;  %v2538_v29 = vld [vmem:[#allocation9 + $0xd0] ss:$8 sps:$4 sm:$0xff]   ;;  %v2539_v11 = vld [vmem:[#allocation9 + $0xe4] ss:$8 sps:$4 sm:$0xff]  }
 0x151   : > { %1056 = vmatprep.subr.bf16.mxu0 %v2515_v47  ;;  %v2541_v30 = vld [vmem:[#allocation9 + $0xe0] ss:$8 sps:$4 sm:$0xff]   ;;  %v2560_v31 = vld [vmem:[#allocation13 + $0x50] ss:$8 sps:$4 sm:$0xff]   ;;  %v2565_v32 = vld [vmem:[#allocation13 + $0x64] ss:$8 sps:$4 sm:$0xff]  }
 0x152   : > { %1204 = vmatpush1.bf16.msra.mxu1 %v2508_v24  ;;  %v835_v46 = vld [vmem:[#allocation3] sm:$0xff]  ;;  %v2563_v12 = vld [vmem:[#allocation13 + $0x60] ss:$8 sps:$4 sm:$0xff]   ;;  %v2574_v19 = vld [vmem:[#allocation12 + $0x4] ss:$8 sps:$4 sm:$0xff]  }
 0x153   : > { %1205 = vmatprep.subr.bf16.mxu1 %v2511_v25  ;;  %v836_v50 = vmul.f32 0.022727273, %v835_v46  ;;  %v2542_v33 = vld [vmem:[#allocation9 + $0xf4] ss:$8 sps:$4 sm:$0xff]   ;;  %v2544_v8 = vld [vmem:[#allocation9 + $0xf0] ss:$8 sps:$4 sm:$0xff]  }
 0x154   : > { %1057 = vmatpush1.bf16.msra.mxu0 %v2519_v49  ;;  %v2568_v34 = vld [vmem:[#allocation13 + $0x74] ss:$8 sps:$4 sm:$0xff]   ;;  %v2566_v35 = vld [vmem:[#allocation13 + $0x70] ss:$8 sps:$4 sm:$0xff]   ;;  %v2571_v36 = vld [vmem:[#allocation13 + $0x84] ss:$8 sps:$4 sm:$0xff]  }
 0x155   : > { %v837_v53 = vpack.c.bf16 %v836_v50, %v836_v50  ;;  %1058 = vmatprep.subr.bf16.mxu0 %v2521_v52  ;;  %v2572_v20 = vld [vmem:[#allocation12] ss:$8 sps:$4 sm:$0xff]   ;;  %v2580_v9 = vld [vmem:[#allocation12 + $0x14] ss:$8 sps:$4 sm:$0xff]   ;;  %v2578_v22 = vld [vmem:[#allocation12 + $0x10] ss:$8 sps:$4 sm:$0xff]  }
 0x156   : > { %1206 = vmatpush1.bf16.msra.mxu1 %v2514_v45  ;;  %v2569_v21 = vld [vmem:[#allocation13 + $0x80] ss:$8 sps:$4 sm:$0xff]   ;;  %v2577_v38 = vld [vmem:[#allocation13 + $0x94] ss:$8 sps:$4 sm:$0xff]   ;;  %v2586_v39 = vld [vmem:[#allocation12 + $0x24] ss:$8 sps:$4 sm:$0xff]  }
 0x157   : > { %1207 = vmatprep.subr.bf16.mxu1 %v2517_v48  ;;  %v2575_v10 = vld [vmem:[#allocation13 + $0x90] ss:$8 sps:$4 sm:$0xff]   ;;  %v2583_v23 = vld [vmem:[#allocation13 + $0xa4] ss:$8 sps:$4 sm:$0xff]   ;;  %v2584_v40 = vld [vmem:[#allocation12 + $0x20] ss:$8 sps:$4 sm:$0xff]  }
 0x158   : > { %1059 = vmatpush1.bf16.msra.mxu0 %v2523_v54  ;;  %v2592_v41 = vld [vmem:[#allocation12 + $0x34] ss:$8 sps:$4 sm:$0xff]   ;;  %v2581_v42 = vld [vmem:[#allocation13 + $0xa0] ss:$8 sps:$4 sm:$0xff]   ;;  %v2590_v24 = vld [vmem:[#allocation12 + $0x30] ss:$8 sps:$4 sm:$0xff]  }
 0x159   : > { %1060 = vmatprep.subr.bf16.mxu0 %v2524_v56  ;;  %v2589_v43 = vld [vmem:[#allocation13 + $0xb4] ss:$8 sps:$4 sm:$0xff]   ;;  %v2587_v15 = vld [vmem:[#allocation13 + $0xb0] ss:$8 sps:$4 sm:$0xff]   ;;  %v2595_v25 = vld [vmem:[#allocation13 + $0xc4] ss:$8 sps:$4 sm:$0xff]  }
 0x15a   : > { %1208 = vmatpush1.bf16.msra.mxu1 %v2520_v51  ;;  %v2593_v44 = vld [vmem:[#allocation13 + $0xc0] ss:$8 sps:$4 sm:$0xff]   ;;  %v2598_v45 = vld [vmem:[#allocation12 + $0x44] ss:$8 sps:$4 sm:$0xff]   ;;  %v2601_v47 = vld [vmem:[#allocation13 + $0xd4] ss:$8 sps:$4 sm:$0xff]  }
 0x15b   : > { %1468 = vmatprep.subr.bf16.mxu1 %v2547_v59  ;;  %v2596_v46 = vld [vmem:[#allocation12 + $0x40] ss:$8 sps:$4 sm:$0xff]   ;;  %v2599_v48 = vld [vmem:[#allocation13 + $0xd0] ss:$8 sps:$4 sm:$0xff]   ;;  %v2604_v50 = vld [vmem:[#allocation12 + $0x54] ss:$8 sps:$4 sm:$0xff]  }
 0x15c   : > { %1061 = vmatpush1.bf16.msra.mxu0 %v2526_v62  ;;  %v2602_v49 = vld [vmem:[#allocation12 + $0x50] ss:$8 sps:$4 sm:$0xff]   ;;  %v2607_v51 = vld [vmem:[#allocation13 + $0xe4] ss:$8 sps:$4 sm:$0xff]   ;;  %v2605_v52 = vld [vmem:[#allocation13 + $0xe0] ss:$8 sps:$4 sm:$0xff]  }
 0x15d   : > { %1226 = vmatmul.mubr.bf16.vlgmr.msra.gmra.mrb[0].mxu1 %v837_v53  ;;  %1062 = vmatprep.subr.bf16.mxu0 %v2527_v63  ;;  %v2610_v53 = vld [vmem:[#allocation12 + $0x64] ss:$8 sps:$4 sm:$0xff]   ;;  %v2608_v54 = vld [vmem:[#allocation12 + $0x60] ss:$8 sps:$4 sm:$0xff]   ;;  %v2613_v55 = vld [vmem:[#allocation13 + $0xf4] ss:$8 sps:$4 sm:$0xff]  }
 0x15e   : > { %1469 = vmatpush1.bf16.msra.mxu1 %v2545_v58  ;;  %v2616_v56 = vld [vmem:[#allocation12 + $0x74] ss:$8 sps:$4 sm:$0xff]   ;;  %v2611_v57 = vld [vmem:[#allocation13 + $0xf0] ss:$8 sps:$4 sm:$0xff]   ;;  %v2619_v59 = vld [vmem:[#allocation15 + $0x4] ss:$8 sps:$4 sm:$0xff]  }
 0x15f   : > { %1470 = vmatprep.subr.bf16.mxu1 %v2550_v61  ;;  %v2614_v58 = vld [vmem:[#allocation12 + $0x70] ss:$8 sps:$4 sm:$0xff]   ;;  %v2622_v60 = vld [vmem:[#allocation12 + $0x84] ss:$8 sps:$4 sm:$0xff]   ;;  %v2620_v61 = vld [vmem:[#allocation12 + $0x80] ss:$8 sps:$4 sm:$0xff]  }
 0x160   : > { %1063 = vmatpush1.bf16.msra.mxu0 %v2529_v13  ;;  %v2626_v62 = vld [vmem:[#allocation12 + $0x90] ss:$8 sps:$4 sm:$0xff]   ;;  %v2628_v63 = vld [vmem:[#allocation12 + $0x94] ss:$8 sps:$4 sm:$0xff]  }
 0x161   : > { %1064 = vmatprep.subr.bf16.mxu0 %v2530_v14  ;;  %v2638_v13 = vld [vmem:[#allocation12 + $0xb0] ss:$8 sps:$4 sm:$0xff]   ;;  %v2640_v14 = vld [vmem:[#allocation12 + $0xb4] ss:$8 sps:$4 sm:$0xff]  }
 0x162   : > { %1471 = vmatpush1.bf16.msra.mxu1 %v2548_v2  ;;  %v2632_v2 = vld [vmem:[#allocation12 + $0xa0] ss:$8 sps:$4 sm:$0xff]  }
 0x163   : > { %1472 = vmatprep.subr.bf16.mxu1 %v2553_v3  ;;  %v2634_v3 = vld [vmem:[#allocation12 + $0xa4] ss:$8 sps:$4 sm:$0xff]  }
 0x164   : > { %1065 = vmatpush1.bf16.msra.mxu0 %v2532_v4  ;;  %v2650_v4 = vld [vmem:[#allocation12 + $0xd0] ss:$8 sps:$4 sm:$0xff]  }
 0x165   : > { %1066 = vmatprep.subr.bf16.mxu0 %v2533_v6  ;;  %v2652_v6 = vld [vmem:[#allocation12 + $0xd4] ss:$8 sps:$4 sm:$0xff]  }
 0x166   : > { %1473 = vmatpush1.bf16.msra.mxu1 %v2551_v16  ;;  %v2646_v16 = vld [vmem:[#allocation12 + $0xc4] ss:$8 sps:$4 sm:$0xff]  }
 0x167   : > { %1474 = vmatprep.subr.bf16.mxu1 %v2556_v0  ;;  %v2644_v0 = vld [vmem:[#allocation12 + $0xc0] ss:$8 sps:$4 sm:$0xff]  }
 0x168   : > { %1067 = vmatpush1.bf16.msra.mxu0 %v2535_v27  ;;  %v2662_v27 = vld [vmem:[#allocation12 + $0xf0] ss:$8 sps:$4 sm:$0xff]  }
 0x169   : > { %1068 = vmatprep.subr.bf16.mxu0 %v2536_v1  ;;  %v2664_v1 = vld [vmem:[#allocation12 + $0xf4] ss:$8 sps:$4 sm:$0xff]  }
 0x16a   : > { %1475 = vmatpush1.bf16.msra.mxu1 %v2554_v17  ;;  %v2656_v17 = vld [vmem:[#allocation12 + $0xe0] ss:$8 sps:$4 sm:$0xff]  }
 0x16b   : > { %1476 = vmatprep.subr.bf16.mxu1 %v2559_v26  ;;  %v2658_v26 = vld [vmem:[#allocation12 + $0xe4] ss:$8 sps:$4 sm:$0xff]  }
 0x16c   : > { %1069 = vmatpush1.bf16.msra.mxu0 %v2538_v29 }
 0x16d   : > { %1070 = vmatprep.subr.bf16.mxu0 %v2539_v11  ;;  %v1101_v11 = vld [vmem:[%s3611_s4] sm:$0x3] }
 0x16e   : > { %1477 = vmatpush1.bf16.msra.mxu1 %v2557_v5  ;;  %v872_v5 = vlaneseq }
 0x16f   : > { %1478 = vmatprep.subr.bf16.mxu1 %v2562_v28 }
 0x170   : > { %1071 = vmatpush1.bf16.msra.mxu0 %v2541_v30  ;;  %v873_v28 = vshrl.u32 %v872_v5, 7  ;;  %v2686_v5 = vld [vmem:[#allocation15 + $0xf0] ss:$8 sps:$4 sm:$0xff]  }
 0x171   : > { %1072 = vmatprep.subr.bf16.mxu0 %v2542_v33 }
 0x172   : > { %1479 = vmatpush1.bf16.msra.mxu1 %v2560_v31  ;;  %v3501_v29 = vsub.s32 0, %v873_v28  ;;  %v3506_v30 = vsub.s32 1, %v873_v28 }
 0x173   : > { %1480 = vmatprep.subr.bf16.mxu1 %v2565_v32 }
 0x174   : > { %1073 = vmatpush1.bf16.msra.mxu0 %v2544_v8  ;;  %v1106_v7 = vrot.slane %v1101_v11, %v3501_v29  ;;  %v1110_v31 = vrot.slane %v1101_v11, %v3506_v30 }
 0x175   : > { %1669 = vmatprep.subr.bf16.mxu0 %v2574_v19 }
 0x176   : > { %1481 = vmatpush1.bf16.msra.mxu1 %v2563_v12 }
 0x177   : > { %1482 = vmatprep.subr.bf16.mxu1 %v2568_v34  ;;  %1075 = vmatmul.mubr.bf16.vlgmr.msra.gmra.mrb[0].mxu0 %v833_v37 }
 0x178   : > { %1670 = vmatpush1.bf16.msra.mxu0 %v2572_v20  ;;  %v2617_v20 = vld [vmem:[#allocation15] ss:$8 sps:$4 sm:$0xff]  }
 0x179   : > { %1671 = vmatprep.subr.bf16.mxu0 %v2580_v9  ;;  %v2625_v9 = vld [vmem:[#allocation15 + $0x14] ss:$8 sps:$4 sm:$0xff]  }
 0x17a   : > { %1483 = vmatpush1.bf16.msra.mxu1 %v2566_v35 }
 0x17b   : > { %1484 = vmatprep.subr.bf16.mxu1 %v2571_v36 }
 0x17c   : > { %1672 = vmatpush1.bf16.msra.mxu0 %v2578_v22  ;;  %v2629_v22 = vld [vmem:[#allocation15 + $0x20] ss:$8 sps:$4 sm:$0xff]  }
 0x17d   : > { %1673 = vmatprep.subr.bf16.mxu0 %v2586_v39  ;;  %v2637_v39 = vld [vmem:[#allocation15 + $0x34] ss:$8 sps:$4 sm:$0xff]  }
 0x17e   : > { %1485 = vmatpush1.bf16.msra.mxu1 %v2569_v21  ;;  %v2623_v21 = vld [vmem:[#allocation15 + $0x10] ss:$8 sps:$4 sm:$0xff]  }
 0x17f   : > { %1486 = vmatprep.subr.bf16.mxu1 %v2577_v38  ;;  %v2631_v38 = vld [vmem:[#allocation15 + $0x24] ss:$8 sps:$4 sm:$0xff]  }
 0x180   : > { %1674 = vmatpush1.bf16.msra.mxu0 %v2584_v40  ;;  %v2643_v40 = vld [vmem:[#allocation15 + $0x44] ss:$8 sps:$4 sm:$0xff]  }
 0x181   : > { %1675 = vmatprep.subr.bf16.mxu0 %v2592_v41 }
 0x182   : > { %1487 = vmatpush1.bf16.msra.mxu1 %v2575_v10  ;;  %v870_v10 = vld [vmem:[%s3612_s9] sm:$0x3] }
 0x183   : > { %1488 = vmatprep.subr.bf16.mxu1 %v2583_v23  ;;  %v2635_v23 = vld [vmem:[#allocation15 + $0x30] ss:$8 sps:$4 sm:$0xff]   ;;  %v875_v41 = vrot.slane %v870_v10, %v3501_v29 }
 0x184   : > { %1676 = vmatpush1.bf16.msra.mxu0 %v2590_v24 }
 0x185   : > { %1677 = vmatprep.subr.bf16.mxu0 %v2598_v45 }
 0x186   : > { %1489 = vmatpush1.bf16.msra.mxu1 %v2581_v42  ;;  %v879_v42 = vrot.slane %v870_v10, %v3506_v30 }
 0x187   : > { %1490 = vmatprep.subr.bf16.mxu1 %v2589_v43  ;;  %v2641_v43 = vld [vmem:[#allocation15 + $0x40] ss:$8 sps:$4 sm:$0xff]  }
 0x188   : > { %1678 = vmatpush1.bf16.msra.mxu0 %v2596_v46 }
 0x189   : > { %1679 = vmatprep.subr.bf16.mxu0 %v2604_v50  ;;  %v2653_v50 = vld [vmem:[#allocation15 + $0x60] ss:$8 sps:$4 sm:$0xff]  }
 0x18a   : > { %1491 = vmatpush1.bf16.msra.mxu1 %v2587_v15  ;;  %v2649_v15 = vld [vmem:[#allocation15 + $0x54] ss:$8 sps:$4 sm:$0xff]  }
 0x18b   : > { %1492 = vmatprep.subr.bf16.mxu1 %v2595_v25 }
 0x18c   : > { %1680 = vmatpush1.bf16.msra.mxu0 %v2602_v49  ;;  %v2655_v49 = vld [vmem:[#allocation15 + $0x64] ss:$8 sps:$4 sm:$0xff]  }
 0x18d   : > { %1681 = vmatprep.subr.bf16.mxu0 %v2610_v53  ;;  %v2667_v53 = vld [vmem:[#allocation15 + $0x84] ss:$8 sps:$4 sm:$0xff]  }
 0x18e   : > { %1493 = vmatpush1.bf16.msra.mxu1 %v2593_v44 }
 0x18f   : > { %1494 = vmatprep.subr.bf16.mxu1 %v2601_v47  ;;  %v2647_v47 = vld [vmem:[#allocation15 + $0x50] ss:$8 sps:$4 sm:$0xff]  }
 0x190   : > { %1682 = vmatpush1.bf16.msra.mxu0 %v2608_v54 }
 0x191   : > { %1683 = vmatprep.subr.bf16.mxu0 %v2616_v56 }
 0x192   : > { %1495 = vmatpush1.bf16.msra.mxu1 %v2599_v48 }
 0x193   : > { %1496 = vmatprep.subr.bf16.mxu1 %v2607_v51  ;;  %v2661_v51 = vld [vmem:[#allocation15 + $0x74] ss:$8 sps:$4 sm:$0xff]  }
 0x194   : > { %1684 = vmatpush1.bf16.msra.mxu0 %v2614_v58 }
 0x195   : > { %1685 = vmatprep.subr.bf16.mxu0 %v2622_v60 }
 0x196   : > { %1497 = vmatpush1.bf16.msra.mxu1 %v2605_v52  ;;  %v2659_v52 = vld [vmem:[#allocation15 + $0x70] ss:$8 sps:$4 sm:$0xff]  }
 0x197   : > { %1498 = vmatprep.subr.bf16.mxu1 %v2613_v55 }
 0x198   : > { %1686 = vmatpush1.bf16.msra.mxu0 %v2620_v61  ;;  %v2670_v61 = vld [vmem:[#allocation15 + $0x94] ss:$8 sps:$4 sm:$0xff]  }
 0x199   : > { %1687 = vmatprep.subr.bf16.mxu0 %v2628_v63  ;;  %v2668_v63 = vld [vmem:[#allocation15 + $0x90] ss:$8 sps:$4 sm:$0xff]  }
 0x19a   : > { %1499 = vmatpush1.bf16.msra.mxu1 %v2611_v57 }
 0x19b   : > { %1904 = vmatprep.subr.bf16.mxu1 %v2619_v59  ;;  %v2665_v59 = vld [vmem:[#allocation15 + $0x80] ss:$8 sps:$4 sm:$0xff]  }
 0x19c   : > { %1688 = vmatpush1.bf16.msra.mxu0 %v2626_v62 }
 0x19d   : > { %1689 = vmatprep.subr.bf16.mxu0 %v2634_v3  ;;  %v2673_v3 = vld [vmem:[#allocation15 + $0xa4] ss:$8 sps:$4 sm:$0xff]  }
 0x1a0   : > { %1690 = vmatpush1.bf16.msra.mxu0 %v2632_v2 }
 0x1a1   : > { %1691 = vmatprep.subr.bf16.mxu0 %v2640_v14  ;;  %v2676_v14 = vld [vmem:[#allocation15 + $0xb4] ss:$8 sps:$4 sm:$0xff]  }
 0x1a4   : > { %1692 = vmatpush1.bf16.msra.mxu0 %v2638_v13  ;;  %v2671_v13 = vld [vmem:[#allocation15 + $0xa0] ss:$8 sps:$4 sm:$0xff]  }
 0x1a5   : > { %1693 = vmatprep.subr.bf16.mxu0 %v2646_v16  ;;  %v2674_v16 = vld [vmem:[#allocation15 + $0xb0] ss:$8 sps:$4 sm:$0xff]  }
 0x1a8   : > { %1694 = vmatpush1.bf16.msra.mxu0 %v2644_v0  ;;  %v2679_v0 = vld [vmem:[#allocation15 + $0xc4] ss:$8 sps:$4 sm:$0xff]  }
 0x1a9   : > { %1695 = vmatprep.subr.bf16.mxu0 %v2652_v6  ;;  %v2682_v6 = vld [vmem:[#allocation15 + $0xd4] ss:$8 sps:$4 sm:$0xff]  }
 0x1ac   : > { %1696 = vmatpush1.bf16.msra.mxu0 %v2650_v4  ;;  %v2677_v4 = vld [vmem:[#allocation15 + $0xc0] ss:$8 sps:$4 sm:$0xff]  }
 0x1ad   : > { %1697 = vmatprep.subr.bf16.mxu0 %v2658_v26  ;;  %v2685_v26 = vld [vmem:[#allocation15 + $0xe4] ss:$8 sps:$4 sm:$0xff]  }
 0x1b0   : > { %1698 = vmatpush1.bf16.msra.mxu0 %v2656_v17  ;;  %v2680_v17 = vld [vmem:[#allocation15 + $0xd0] ss:$8 sps:$4 sm:$0xff]  }
 0x1b1   : > { %1699 = vmatprep.subr.bf16.mxu0 %v2664_v1  ;;  %v2688_v1 = vld [vmem:[#allocation15 + $0xf4] ss:$8 sps:$4 sm:$0xff]  }
 0x1b4   : > { %1700 = vmatpush1.bf16.msra.mxu0 %v2662_v27  ;;  %v2683_v27 = vld [vmem:[#allocation15 + $0xe0] ss:$8 sps:$4 sm:$0xff]  }
 0x230   : > { %v1227_v32 = vpop.f32.mrb[0].mxu1 }
 0x231   : > { %v1228_v33 = vadd.f32 %v1227_v32, %v1106_v7  ;;  %v1229_v12 = vpop.f32.mrb[1].mxu1 }
 0x232   : > { %v1230_v34 = vadd.f32 %v1229_v12, %v1110_v31  ;;  %v1231_v8 = vpop.f32.mrb[2].mxu1 }
 0x233   : > { %2689 = vtanh.f32 %v1228_v33  ;;  %v1232_v18 = vpop.f32.mrb[3].mxu1 }
 0x234   : > { %2691 = vtanh.f32 %v1230_v34 }
 0x23d   : > { %v3510_v19 = vpop.eup %2689 }
 0x23e   : > { %v2692_v35 = vpop.eup %2691  ;;  %v1274_v37 = vpack.c.bf16 %v3510_v19, %v3510_v19 }
 0x23f   : > { %v1275_v36 = vpack.c.bf16 %v2692_v35, %v2692_v35 }
 0x241   : > { %1500 = vmatprep.mubr.bf16.mxu1 %v1275_v36  ;;  %v1947_v36 = vld [vmem:[%s3613_s12] sm:$0x3] }
 0x242   : > { %1501 = vmatmul.mubr.bf16.vlgmr.msra.gmra.mrb[4].mxu1 %v1274_v37 }
 0x243   : > { %1905 = vmatpush1.bf16.msra.mxu1 %v2617_v20  ;;  %v1952_v20 = vrot.slane %v1947_v36, %v3501_v29 }
 0x244   : > { %1906 = vmatprep.subr.bf16.mxu1 %v2625_v9  ;;  %v1956_v9 = vrot.slane %v1947_v36, %v3506_v30 }
 0x247   : > { %1907 = vmatpush1.bf16.msra.mxu1 %v2623_v21  ;;  %v1963_v21 = vld [vmem:[%s3614_s7] sm:$0x3] }
 0x248   : > { %1908 = vmatprep.subr.bf16.mxu1 %v2631_v38 }
 0x24a   : > { %v1076_v24 = vpop.f32.mrb[0].mxu0 }
 0x24b   : > { %1909 = vmatpush1.bf16.msra.mxu1 %v2629_v22  ;;  %v1077_v25 = vadd.f32 %v1076_v24, %v875_v41  ;;  %v1078_v44 = vpop.f32.mrb[1].mxu0  ;;  %v1968_v41 = vrot.slane %v1963_v21, %v3501_v29 }
 0x24c   : > { %1910 = vmatprep.subr.bf16.mxu1 %v2637_v39  ;;  %v1079_v45 = vadd.f32 %v1078_v44, %v879_v42  ;;  %v1080_v46 = vpop.f32.mrb[2].mxu0 }
 0x24d   : > { %2693 = vtanh.f32 %v1077_v25  ;;  %v1081_v48 = vpop.f32.mrb[3].mxu0  ;;  %v2314_v46 = vld [vmem:[#allocation4] ss:$0 sm:$0xff] }
 0x24e   : > { %2695 = vtanh.f32 %v1079_v45 }
 0x24f   : > { %1911 = vmatpush1.bf16.msra.mxu1 %v2635_v23 }
 0x250   : > { %1912 = vmatprep.subr.bf16.mxu1 %v2643_v40 }
 0x253   : > { %1913 = vmatpush1.bf16.msra.mxu1 %v2641_v43  ;;  %v1972_v43 = vrot.slane %v1963_v21, %v3506_v30 }
 0x254   : > { %1914 = vmatprep.subr.bf16.mxu1 %v2649_v15 }
 0x257   : > { %1915 = vmatpush1.bf16.msra.mxu1 %v2647_v47  ;;  %v2694_v54 = vpop.eup %2693 }
 0x258   : > { %1916 = vmatprep.subr.bf16.mxu1 %v2655_v49  ;;  %v2696_v55 = vpop.eup %2695  ;;  %v1240_v56 = vpack.c.bf16 %v2694_v54, %v2694_v54  ;;  %v1236_v57 = vsub.f32 %v2694_v54, %v3510_v19 }
 0x259   : > { %v1241_v58 = vpack.c.bf16 %v2696_v55, %v2696_v55  ;;  %v1237_v60 = vsub.f32 %v2696_v55, %v2692_v35 }
 0x25a   : > { %v1238_v28 = vand.u32 2147483647, %v1236_v57 }
 0x25b   : > { %1917 = vmatpush1.bf16.msra.mxu1 %v2653_v50  ;;  %1701 = vmatprep.mubr.bf16.mxu0 %v1241_v58  ;;  %v1239_v62 = vand.u32 2147483647, %v1237_v60 }
 0x25c   : > { %1918 = vmatprep.subr.bf16.mxu1 %v2661_v51  ;;  %1702 = vmatmul.mubr.bf16.vlgmr.msra.gmra.mrb[4].mxu0 %v1240_v56  ;;  %v1710_v11 = vpack.c.bf16 %v1238_v28, %v1238_v28 }
 0x25d   : > { %v1711_v2 = vpack.c.bf16 %v1239_v62, %v1239_v62 }
 0x25f   : > { %1919 = vmatpush1.bf16.msra.mxu1 %v2659_v52  ;;  %1936 = vmatprep.mubr.bf16.mxu1 %v1711_v2 }
 0x260   : > { %1920 = vmatprep.subr.bf16.mxu1 %v2667_v53 }
 0x263   : > { %1921 = vmatpush1.bf16.msra.mxu1 %v2665_v59 }
 0x264   : > { %1922 = vmatprep.subr.bf16.mxu1 %v2670_v61 }
 0x267   : > { %1923 = vmatpush1.bf16.msra.mxu1 %v2668_v63 }
 0x268   : > { %1924 = vmatprep.subr.bf16.mxu1 %v2673_v3 }
 0x26b   : > { %1925 = vmatpush1.bf16.msra.mxu1 %v2671_v13 }
 0x26c   : > { %1926 = vmatprep.subr.bf16.mxu1 %v2676_v14 }
 0x26f   : > { %1927 = vmatpush1.bf16.msra.mxu1 %v2674_v16 }
 0x270   : > { %1928 = vmatprep.subr.bf16.mxu1 %v2679_v0 }
 0x273   : > { %1929 = vmatpush1.bf16.msra.mxu1 %v2677_v4 }
 0x274   : > { %1930 = vmatprep.subr.bf16.mxu1 %v2682_v6 }
 0x277   : > { %1931 = vmatpush1.bf16.msra.mxu1 %v2680_v17 }
 0x278   : > { %1932 = vmatprep.subr.bf16.mxu1 %v2685_v26 }
 0x27b   : > { %1933 = vmatpush1.bf16.msra.mxu1 %v2683_v27 }
 0x27c   : > { %1934 = vmatprep.subr.bf16.mxu1 %v2688_v1 }
 0x27f   : > { %1935 = vmatpush1.bf16.msra.mxu1 %v2686_v5 }
 0x282   : > { %1937 = vmatmul.mubr.bf16.vlgmr.msra.gmra.mrb[8].mxu1 %v1710_v11 }
 0x315   : > { %v1502_v7 = vpop.f32.mrb[4].mxu1 }
 0x316   : > { %v1504_v31 = vpop.f32.mrb[5].mxu1 }
 0x317   : > { %v1506_v32 = vpop.f32.mrb[6].mxu1 }
 0x318   : > { %v1507_v33 = vpop.f32.mrb[7].mxu1 }
 0x32f   : > { %v1703_v12 = vpop.f32.mrb[4].mxu0 }
 0x330   : > { %v1704_v34 = vadd.f32 %v1703_v12, %v1502_v7  ;;  %v1705_v8 = vpop.f32.mrb[5].mxu0 }
 0x331   : > { %v1706_v18 = vadd.f32 %v1705_v8, %v1504_v31  ;;  %v1707_v19 = vpop.f32.mrb[6].mxu0 }
 0x332   : > { %v1708_v35 = vpop.f32.mrb[7].mxu0 }
 0x355   : > { %v1938_v37 = vpop.f32.mrb[8].mxu1 }
 0x356   : > { %v1945_v38 = vadd.f32 %v1938_v37, %v1704_v34  ;;  %v1940_v22 = vpop.f32.mrb[9].mxu1 }
 0x357   : > { %v1946_v39 = vadd.f32 %v1940_v22, %v1706_v18  ;;  %v1942_v10 = vpop.f32.mrb[10].mxu1 }
 0x358   : > { %v1959_v23 = vadd.f32 %v1952_v20, %v1945_v38  ;;  %v1943_v40 = vpop.f32.mrb[11].mxu1 }
 0x359   : > { %v1960_v42 = vadd.f32 %v1956_v9, %v1946_v39 }
 0x35a   : > { %v1961_v24 = vmax.f32 %v1959_v23, 0.0 }
 0x35b   : > { %v1962_v15 = vmax.f32 %v1960_v42, 0.0 }
 0x35c   : > { %v1975_v25 = vmul.f32 %v1968_v41, %v1961_v24 }
 0x35d   : > { %v1976_v44 = vmul.f32 %v1972_v43, %v1962_v15 }
 0x35f   : > { %v1977_v45 = vadd.f32 %v1976_v44, %v1975_v25 }
 0x361   : > { %1978 = vadd.xlane.f32.xlu0 %v1977_v45 }
 0x3ee   : > { %v1979_v47 = vpop.xlane.xlu0 %1978 }
 0x3ef   : > { %v1987_v48 = vadd.f32 %v2314_v46, %v1979_v47 }
 0x3f1   : > { %1989 = vst.msk [vmem:[%s3395_s6] sm:$0xff] %vm1988_vm7, %v1987_v48 }
 0x3f2 PF: > { %s32_s29 = sadd.s32 1, %s2979_s29   ;;  %s3615_s23 = smov %s2955_s24 }
 0x3f3   : > { %p29_p3 = scmp.ge.s32.totalorder %s32_s29, 14   ;;  %s3616_s24 = smov %s2959_s25 }
 0x3f4   : > { %s3617_s25 = smov %s3285_s26  ;;  %s3618_s26 = smov %s2971_s28 }
 0x3f5   : > { %s3619_s27 = smov %s2975_s11  ;;  %s3620_s28 = smov %s3623_s3 }
 0x3f6   : > { %s3621_s11 = smov %s3627_s18  ;;  %31 = sbr.rel (!%p29_p3) target bundleno = 21 (0x15), region = 149 }
 0x3fd   :  { %2009 = vsyncpa [#allocation6], 1 }
 0x3fe   :  { %2011 = vsyncpa [#allocation6 + $0x1], 1 }
 0x3ff   :  { %2012 = vsyncpa [#allocation8], 1 }
 0x400   :  { %2014 = vsyncpa [#allocation8 + $0x1], 1 }
 0x401   :  { %2015 = vsyncpa [#allocation11], 1 }
 0x402   :  { %2016 = vsyncpa [#allocation14], 1 }

</bundles_post_ra>
